<compile_context>
chip_gen: v6e
topology: v6e:2x2x1
jax: 0.10.0
libtpu: 0.0.40
codegen_flags: <defaults>
</compile_context>

<pallas_src>
import jax
import jax.numpy as jnp
import numpy as np
from jax import lax
from jax.experimental import pallas as pl
from jax.experimental.pallas import tpu as pltpu


def _round_up(a, b):
    return ((a + b - 1) // b) * b


def _make_conv_tap_kernel(tap_offsets, tm, halo_pad):
    """k^3-tap accumulation kernel.

    Refs:
      w_ref  : (n_taps, cout_p, cin_p)  per-tap weight slabs (grid-invariant)
      x0_ref : (1, cin_p, tm)           current flattened input tile
      x1_ref : (1, cin_p, halo_pad)     halo: first columns of the next tile
      o_ref  : (1, cout_p, tm)          output tile (lane-dense)
      xs_ref : (cin_p, tm + halo_pad)   VMEM scratch: stitched tile + halo
    """

    def kernel(w_ref, x0_ref, x1_ref, o_ref, xs_ref):
        # Stitch the current tile and its right halo once; every tap then
        # reads a statically shifted (cin_p, tm) window of this scratch.
        xs_ref[:, :tm] = x0_ref[0]
        xs_ref[:, tm:] = x1_ref[0]

        cout_p = o_ref.shape[1]
        acc = jnp.zeros((cout_p, tm), jnp.float32)
        for t, off in enumerate(tap_offsets):           # static unrolled loop
            acc = acc + jnp.dot(
                w_ref[t], xs_ref[:, off:off + tm],
                preferred_element_type=jnp.float32)
        o_ref[0] = acc.astype(o_ref.dtype)

    return kernel


def linear_kernel_forward(x, weight, *, tile_m_target=2048):
    """Forward of LinearKernel (dimension=3):
       y = Conv3d(x; weight), stride 1, padding=round((k-1)/2), no bias.

    x      : (N, C_in, D, H, W)       float32, NCDHW (PyTorch convention)
    weight : (C_out, C_in, k, k, k)   PyTorch Conv3d weight layout
    returns: (N, C_out, D, H, W)
    """
    N, cin, D, H, W = x.shape
    cout, cin_w, k, kh, kw = weight.shape
    assert cin_w == cin and k == kh == kw
    # TODO(synk): like the PyTorch module, only odd kernel_size yields a
    # correctly aligned 'same'-sized output; even k is not handled.
    p = int(np.round((k - 1) / 2))

    cin_p = _round_up(cin, 8)       # sublane-dense contraction rows
    cout_p = _round_up(cout, 8)     # sublane-dense output rows
    n_taps = k * k * k

    Dp, Hp, Wp = D + 2 * p, H + 2 * p, W + 2 * p
    mp = Dp * Hp * Wp                                # per-batch padded flat len
    halo = (k - 1) * (Hp * Wp + Wp + 1)              # max tap column offset
    halo_pad = _round_up(max(halo, 1), 128)

    # Tile of the flattened per-batch axis: lane-dense (multiple of 128) and a
    # multiple of halo_pad so the narrow halo view lands on its block edges.
    tm = _round_up(max(min(tile_m_target, mp), halo_pad), halo_pad)
    nt = (mp + tm - 1) // tm
    # TODO(synk): for very large Hp*Wp combined with large C_in the halo (and
    # hence the minimum tile) grows; a plane-tiled 2-level scheme would be
    # needed to keep VMEM bounded in that regime.

    # ---- wrapper-side glue (cheap pads only; no 27x materialization) -------
    # Pad channels + spatial once, flatten (free reshape), then pad the flat
    # axis so the last tile still has a full halo to its right.
    xp = jnp.pad(x, ((0, 0), (0, cin_p - cin), (p, p), (p, p), (p, p)))
    xk = xp.reshape(N, cin_p, mp)
    xk = jnp.pad(xk, ((0, 0), (0, 0), (0, nt * tm + halo_pad - mp)))

    # Weight -> tap-major (k^3, cout_p, cin_p), matching tap_offsets order.
    wk = jnp.transpose(weight, (2, 3, 4, 0, 1)).reshape(n_taps, cout, cin)
    wk = jnp.pad(wk, ((0, 0), (0, cout_p - cout), (0, cin_p - cin)))

    tap_offsets = tuple(a * Hp * Wp + b * Wp + c
                        for a in range(k) for b in range(k) for c in range(k))

    kernel = _make_conv_tap_kernel(tap_offsets, tm, halo_pad)

    # Explicit scoped-VMEM budget: double-buffered blocks + scratch (+margin).
    est = (2 * n_taps * cout_p * _round_up(cin_p, 128) * 4   # weight (padded)
           + 2 * cin_p * tm * 4                              # main x tile
           + 2 * cin_p * halo_pad * 4                        # halo view
           + 2 * cout_p * tm * 4                             # out tile
           + cin_p * (tm + halo_pad) * 4)                    # scratch
    vmem_limit = int(min(32 * 2**20, max(8 * 2**20, 4 * est)))

    bpt = tm // halo_pad  # halo-view blocks per main tile

    out = pl.pallas_call(
        kernel,
        out_shape=jax.ShapeDtypeStruct((N, cout_p, nt * tm), x.dtype),
        grid=(N, nt),
        in_specs=[
            # Grid-invariant per-tap weight slabs (never re-fetched).
            pl.BlockSpec((n_taps, cout_p, cin_p), lambda n, i: (0, 0, 0)),
            # Current flattened tile of batch n.
            pl.BlockSpec((1, cin_p, tm), lambda n, i: (n, 0, i)),
            # Narrow halo view: first halo_pad columns of the *next* tile
            # (same input array, smaller block size -> only ~halo/tm extra
            # HBM read instead of a full second tile).
            pl.BlockSpec((1, cin_p, halo_pad),
                         lambda n, i: (n, 0, (i + 1) * bpt)),
        ],
        out_specs=pl.BlockSpec((1, cout_p, tm), lambda n, i: (n, 0, i)),
        scratch_shapes=[pltpu.VMEM((cin_p, tm + halo_pad), jnp.float32)],
        compiler_params=pltpu.CompilerParams(
            dimension_semantics=("parallel", "parallel"),
            vmem_limit_bytes=vmem_limit),
    )(wk, xk, xk)

    # Output is already batch-major; just drop channel / spatial padding.
    out = out[:, :cout, :mp].reshape(N, cout, Dp, Hp, Wp)
    return out[:, :, :D, :H, :W]


def _reference(x, weight, p):
    dn = ("NCDHW", "OIDHW", "NCDHW")
    return lax.conv_general_dilated(
        x, weight, window_strides=(1, 1, 1), padding=[(p, p)] * 3,
        dimension_numbers=dn)


if __name__ == "__main__":
    key = jax.random.PRNGKey(0)
    k_x, k_w = jax.random.split(key, 2)

    # Small shapes consistent with the module: N=2, C_in=4, C_out=4,
    # D=H=W=8, kernel_size=3.
    N, cin, cout, D, H, W, ks = 2, 4, 4, 8, 8, 8, 3
    pad = int(np.round((ks - 1) / 2))

    x = jax.random.normal(k_x, (N, cin, D, H, W), dtype=jnp.float32)
    weight = 0.1 * jax.random.normal(k_w, (cout, cin, ks, ks, ks),
                                     dtype=jnp.float32)

    fwd = jax.jit(linear_kernel_forward)
    out = jax.block_until_ready(fwd(x, weight))

    ref = jax.block_until_ready(_reference(x, weight, pad))
    np.testing.assert_allclose(np.asarray(out), np.asarray(ref),
                               rtol=1e-4, atol=1e-4)
    assert out.shape == (N, cout, D, H, W)
    assert out.dtype == jnp.float32

    print("KERNEL_OK")
</pallas_src>

<mosaic_0001>
module attributes {stable_mosaic.version = 11 : i64} {
  func.func @kernel(%arg0: i32, %arg1: i32, %arg2: memref<27x8x8xf32, #tpu.memory_space<vmem>>, %arg3: memref<1x8x1024xf32, #tpu.memory_space<vmem>>, %arg4: memref<1x8x256xf32, #tpu.memory_space<vmem>>, %arg5: memref<1x8x1024xf32, #tpu.memory_space<vmem>>, %arg6: memref<8x1280xf32, #tpu.memory_space<vmem>>) attributes {dimension_semantics = [#tpu.dimension_semantics<parallel>, #tpu.dimension_semantics<parallel>], iteration_bounds = array<i64: 2, 1>, scalar_prefetch = 0 : i64, scratch_operands = 1 : i64, tpu.core_type = #tpu.core_type<tc>, window_params = [{pipeline_mode = #tpu.pipeline_mode<synchronous>, transform_indices = @transform_0, window_bounds = array<i64: 27, 8, 8>}, {transform_indices = @transform_1, window_bounds = array<i64: 1, 8, 1024>}, {transform_indices = @transform_2, window_bounds = array<i64: 1, 8, 256>}, {transform_indices = @transform_3, window_bounds = array<i64: 1, 8, 1024>}]} {
    %c0 = arith.constant 0 : index
    %c0_0 = arith.constant 0 : index
    %c0_1 = arith.constant 0 : index
    %0 = vector.load %arg3[%c0, %c0_0, %c0_1] : memref<1x8x1024xf32, #tpu.memory_space<vmem>>, vector<1x8x1024xf32>
    %1 = vector.shape_cast %0 : vector<1x8x1024xf32> to vector<8x1024xf32>
    %c0_2 = arith.constant 0 : index
    %c0_3 = arith.constant 0 : index
    %2 = vector.load %arg6[%c0_2, %c0_3] : memref<8x1280xf32, #tpu.memory_space<vmem>>, vector<8x1024xf32>
    tpu.vector_store %arg6[%c0_2, %c0_3], %1 {strides = array<i32>} : memref<8x1280xf32, #tpu.memory_space<vmem>>, vector<8x1024xf32>,
    %c0_4 = arith.constant 0 : index
    %c0_5 = arith.constant 0 : index
    %c0_6 = arith.constant 0 : index
    %3 = vector.load %arg4[%c0_4, %c0_5, %c0_6] : memref<1x8x256xf32, #tpu.memory_space<vmem>>, vector<1x8x256xf32>
    %4 = vector.shape_cast %3 : vector<1x8x256xf32> to vector<8x256xf32>
    %c0_7 = arith.constant 0 : index
    %c1024 = arith.constant 1024 : index
    %5 = vector.load %arg6[%c0_7, %c1024] : memref<8x1280xf32, #tpu.memory_space<vmem>>, vector<8x256xf32>
    tpu.vector_store %arg6[%c0_7, %c1024], %4 {strides = array<i32>} : memref<8x1280xf32, #tpu.memory_space<vmem>>, vector<8x256xf32>,
    %cst = arith.constant 0.000000e+00 : f32
    %6 = vector.broadcast %cst : f32 to vector<8x1024xf32>
    %c0_8 = arith.constant 0 : index
    %c0_9 = arith.constant 0 : index
    %c0_10 = arith.constant 0 : index
    %7 = vector.load %arg2[%c0_8, %c0_9, %c0_10] : memref<27x8x8xf32, #tpu.memory_space<vmem>>, vector<1x8x8xf32>
    %8 = vector.shape_cast %7 : vector<1x8x8xf32> to vector<8x8xf32>
    %c0_11 = arith.constant 0 : index
    %c0_12 = arith.constant 0 : index
    %9 = vector.load %arg6[%c0_11, %c0_12] : memref<8x1280xf32, #tpu.memory_space<vmem>>, vector<8x1024xf32>
    %cst_13 = arith.constant dense<0.000000e+00> : vector<8x1024xf32>
    %10 = tpu.matmul %8, %9, %cst_13 {dimension_numbers = #tpu.dot_dimension_numbers<[1], [0], [0], [1], [0, 0, 1, 1], [], []>} : vector<8x8xf32>, vector<8x1024xf32>, vector<8x1024xf32> -> vector<8x1024xf32>
    %11 = arith.addf %6, %10 : vector<8x1024xf32>
    %c1 = arith.constant 1 : index
    %c0_14 = arith.constant 0 : index
    %c0_15 = arith.constant 0 : index
    %12 = vector.load %arg2[%c1, %c0_14, %c0_15] : memref<27x8x8xf32, #tpu.memory_space<vmem>>, vector<1x8x8xf32>
    %13 = vector.shape_cast %12 : vector<1x8x8xf32> to vector<8x8xf32>
    %c0_16 = arith.constant 0 : index
    %c1_17 = arith.constant 1 : index
    %14 = vector.load %arg6[%c0_16, %c1_17] : memref<8x1280xf32, #tpu.memory_space<vmem>>, vector<8x1024xf32>
    %cst_18 = arith.constant dense<0.000000e+00> : vector<8x1024xf32>
    %15 = tpu.matmul %13, %14, %cst_18 {dimension_numbers = #tpu.dot_dimension_numbers<[1], [0], [0], [1], [0, 0, 1, 1], [], []>} : vector<8x8xf32>, vector<8x1024xf32>, vector<8x1024xf32> -> vector<8x1024xf32>
    %16 = arith.addf %11, %15 : vector<8x1024xf32>
    %c2 = arith.constant 2 : index
    %c0_19 = arith.constant 0 : index
    %c0_20 = arith.constant 0 : index
    %17 = vector.load %arg2[%c2, %c0_19, %c0_20] : memref<27x8x8xf32, #tpu.memory_space<vmem>>, vector<1x8x8xf32>
    %18 = vector.shape_cast %17 : vector<1x8x8xf32> to vector<8x8xf32>
    %c0_21 = arith.constant 0 : index
    %c2_22 = arith.constant 2 : index
    %19 = vector.load %arg6[%c0_21, %c2_22] : memref<8x1280xf32, #tpu.memory_space<vmem>>, vector<8x1024xf32>
    %cst_23 = arith.constant dense<0.000000e+00> : vector<8x1024xf32>
    %20 = tpu.matmul %18, %19, %cst_23 {dimension_numbers = #tpu.dot_dimension_numbers<[1], [0], [0], [1], [0, 0, 1, 1], [], []>} : vector<8x8xf32>, vector<8x1024xf32>, vector<8x1024xf32> -> vector<8x1024xf32>
    %21 = arith.addf %16, %20 : vector<8x1024xf32>
    %c3 = arith.constant 3 : index
    %c0_24 = arith.constant 0 : index
    %c0_25 = arith.constant 0 : index
    %22 = vector.load %arg2[%c3, %c0_24, %c0_25] : memref<27x8x8xf32, #tpu.memory_space<vmem>>, vector<1x8x8xf32>
    %23 = vector.shape_cast %22 : vector<1x8x8xf32> to vector<8x8xf32>
    %c0_26 = arith.constant 0 : index
    %c10 = arith.constant 10 : index
    %24 = vector.load %arg6[%c0_26, %c10] : memref<8x1280xf32, #tpu.memory_space<vmem>>, vector<8x1024xf32>
    %cst_27 = arith.constant dense<0.000000e+00> : vector<8x1024xf32>
    %25 = tpu.matmul %23, %24, %cst_27 {dimension_numbers = #tpu.dot_dimension_numbers<[1], [0], [0], [1], [0, 0, 1, 1], [], []>} : vector<8x8xf32>, vector<8x1024xf32>, vector<8x1024xf32> -> vector<8x1024xf32>
    %26 = arith.addf %21, %25 : vector<8x1024xf32>
    %c4 = arith.constant 4 : index
    %c0_28 = arith.constant 0 : index
    %c0_29 = arith.constant 0 : index
    %27 = vector.load %arg2[%c4, %c0_28, %c0_29] : memref<27x8x8xf32, #tpu.memory_space<vmem>>, vector<1x8x8xf32>
    %28 = vector.shape_cast %27 : vector<1x8x8xf32> to vector<8x8xf32>
    %c0_30 = arith.constant 0 : index
    %c11 = arith.constant 11 : index
    %29 = vector.load %arg6[%c0_30, %c11] : memref<8x1280xf32, #tpu.memory_space<vmem>>, vector<8x1024xf32>
    %cst_31 = arith.constant dense<0.000000e+00> : vector<8x1024xf32>
    %30 = tpu.matmul %28, %29, %cst_31 {dimension_numbers = #tpu.dot_dimension_numbers<[1], [0], [0], [1], [0, 0, 1, 1], [], []>} : vector<8x8xf32>, vector<8x1024xf32>, vector<8x1024xf32> -> vector<8x1024xf32>
    %31 = arith.addf %26, %30 : vector<8x1024xf32>
    %c5 = arith.constant 5 : index
    %c0_32 = arith.constant 0 : index
    %c0_33 = arith.constant 0 : index
    %32 = vector.load %arg2[%c5, %c0_32, %c0_33] : memref<27x8x8xf32, #tpu.memory_space<vmem>>, vector<1x8x8xf32>
    %33 = vector.shape_cast %32 : vector<1x8x8xf32> to vector<8x8xf32>
    %c0_34 = arith.constant 0 : index
    %c12 = arith.constant 12 : index
    %34 = vector.load %arg6[%c0_34, %c12] : memref<8x1280xf32, #tpu.memory_space<vmem>>, vector<8x1024xf32>
    %cst_35 = arith.constant dense<0.000000e+00> : vector<8x1024xf32>
    %35 = tpu.matmul %33, %34, %cst_35 {dimension_numbers = #tpu.dot_dimension_numbers<[1], [0], [0], [1], [0, 0, 1, 1], [], []>} : vector<8x8xf32>, vector<8x1024xf32>, vector<8x1024xf32> -> vector<8x1024xf32>
    %36 = arith.addf %31, %35 : vector<8x1024xf32>
    %c6 = arith.constant 6 : index
    %c0_36 = arith.constant 0 : index
    %c0_37 = arith.constant 0 : index
    %37 = vector.load %arg2[%c6, %c0_36, %c0_37] : memref<27x8x8xf32, #tpu.memory_space<vmem>>, vector<1x8x8xf32>
    %38 = vector.shape_cast %37 : vector<1x8x8xf32> to vector<8x8xf32>
    %c0_38 = arith.constant 0 : index
    %c20 = arith.constant 20 : index
    %39 = vector.load %arg6[%c0_38, %c20] : memref<8x1280xf32, #tpu.memory_space<vmem>>, vector<8x1024xf32>
    %cst_39 = arith.constant dense<0.000000e+00> : vector<8x1024xf32>
    %40 = tpu.matmul %38, %39, %cst_39 {dimension_numbers = #tpu.dot_dimension_numbers<[1], [0], [0], [1], [0, 0, 1, 1], [], []>} : vector<8x8xf32>, vector<8x1024xf32>, vector<8x1024xf32> -> vector<8x1024xf32>
    %41 = arith.addf %36, %40 : vector<8x1024xf32>
    %c7 = arith.constant 7 : index
    %c0_40 = arith.constant 0 : index
    %c0_41 = arith.constant 0 : index
    %42 = vector.load %arg2[%c7, %c0_40, %c0_41] : memref<27x8x8xf32, #tpu.memory_space<vmem>>, vector<1x8x8xf32>
    %43 = vector.shape_cast %42 : vector<1x8x8xf32> to vector<8x8xf32>
    %c0_42 = arith.constant 0 : index
    %c21 = arith.constant 21 : index
    %44 = vector.load %arg6[%c0_42, %c21] : memref<8x1280xf32, #tpu.memory_space<vmem>>, vector<8x1024xf32>
    %cst_43 = arith.constant dense<0.000000e+00> : vector<8x1024xf32>
    %45 = tpu.matmul %43, %44, %cst_43 {dimension_numbers = #tpu.dot_dimension_numbers<[1], [0], [0], [1], [0, 0, 1, 1], [], []>} : vector<8x8xf32>, vector<8x1024xf32>, vector<8x1024xf32> -> vector<8x1024xf32>
    %46 = arith.addf %41, %45 : vector<8x1024xf32>
    %c8 = arith.constant 8 : index
    %c0_44 = arith.constant 0 : index
    %c0_45 = arith.constant 0 : index
    %47 = vector.load %arg2[%c8, %c0_44, %c0_45] : memref<27x8x8xf32, #tpu.memory_space<vmem>>, vector<1x8x8xf32>
    %48 = vector.shape_cast %47 : vector<1x8x8xf32> to vector<8x8xf32>
    %c0_46 = arith.constant 0 : index
    %c22 = arith.constant 22 : index
    %49 = vector.load %arg6[%c0_46, %c22] : memref<8x1280xf32, #tpu.memory_space<vmem>>, vector<8x1024xf32>
    %cst_47 = arith.constant dense<0.000000e+00> : vector<8x1024xf32>
    %50 = tpu.matmul %48, %49, %cst_47 {dimension_numbers = #tpu.dot_dimension_numbers<[1], [0], [0], [1], [0, 0, 1, 1], [], []>} : vector<8x8xf32>, vector<8x1024xf32>, vector<8x1024xf32> -> vector<8x1024xf32>
    %51 = arith.addf %46, %50 : vector<8x1024xf32>
    %c9 = arith.constant 9 : index
    %c0_48 = arith.constant 0 : index
    %c0_49 = arith.constant 0 : index
    %52 = vector.load %arg2[%c9, %c0_48, %c0_49] : memref<27x8x8xf32, #tpu.memory_space<vmem>>, vector<1x8x8xf32>
    %53 = vector.shape_cast %52 : vector<1x8x8xf32> to vector<8x8xf32>
    %c0_50 = arith.constant 0 : index
    %c100 = arith.constant 100 : index
    %54 = vector.load %arg6[%c0_50, %c100] : memref<8x1280xf32, #tpu.memory_space<vmem>>, vector<8x1024xf32>
    %cst_51 = arith.constant dense<0.000000e+00> : vector<8x1024xf32>
    %55 = tpu.matmul %53, %54, %cst_51 {dimension_numbers = #tpu.dot_dimension_numbers<[1], [0], [0], [1], [0, 0, 1, 1], [], []>} : vector<8x8xf32>, vector<8x1024xf32>, vector<8x1024xf32> -> vector<8x1024xf32>
    %56 = arith.addf %51, %55 : vector<8x1024xf32>
    %c10_52 = arith.constant 10 : index
    %c0_53 = arith.constant 0 : index
    %c0_54 = arith.constant 0 : index
    %57 = vector.load %arg2[%c10_52, %c0_53, %c0_54] : memref<27x8x8xf32, #tpu.memory_space<vmem>>, vector<1x8x8xf32>
    %58 = vector.shape_cast %57 : vector<1x8x8xf32> to vector<8x8xf32>
    %c0_55 = arith.constant 0 : index
    %c101 = arith.constant 101 : index
    %59 = vector.load %arg6[%c0_55, %c101] : memref<8x1280xf32, #tpu.memory_space<vmem>>, vector<8x1024xf32>
    %cst_56 = arith.constant dense<0.000000e+00> : vector<8x1024xf32>
    %60 = tpu.matmul %58, %59, %cst_56 {dimension_numbers = #tpu.dot_dimension_numbers<[1], [0], [0], [1], [0, 0, 1, 1], [], []>} : vector<8x8xf32>, vector<8x1024xf32>, vector<8x1024xf32> -> vector<8x1024xf32>
    %61 = arith.addf %56, %60 : vector<8x1024xf32>
    %c11_57 = arith.constant 11 : index
    %c0_58 = arith.constant 0 : index
    %c0_59 = arith.constant 0 : index
    %62 = vector.load %arg2[%c11_57, %c0_58, %c0_59] : memref<27x8x8xf32, #tpu.memory_space<vmem>>, vector<1x8x8xf32>
    %63 = vector.shape_cast %62 : vector<1x8x8xf32> to vector<8x8xf32>
    %c0_60 = arith.constant 0 : index
    %c102 = arith.constant 102 : index
    %64 = vector.load %arg6[%c0_60, %c102] : memref<8x1280xf32, #tpu.memory_space<vmem>>, vector<8x1024xf32>
    %cst_61 = arith.constant dense<0.000000e+00> : vector<8x1024xf32>
    %65 = tpu.matmul %63, %64, %cst_61 {dimension_numbers = #tpu.dot_dimension_numbers<[1], [0], [0], [1], [0, 0, 1, 1], [], []>} : vector<8x8xf32>, vector<8x1024xf32>, vector<8x1024xf32> -> vector<8x1024xf32>
    %66 = arith.addf %61, %65 : vector<8x1024xf32>
    %c12_62 = arith.constant 12 : index
    %c0_63 = arith.constant 0 : index
    %c0_64 = arith.constant 0 : index
    %67 = vector.load %arg2[%c12_62, %c0_63, %c0_64] : memref<27x8x8xf32, #tpu.memory_space<vmem>>, vector<1x8x8xf32>
    %68 = vector.shape_cast %67 : vector<1x8x8xf32> to vector<8x8xf32>
    %c0_65 = arith.constant 0 : index
    %c110 = arith.constant 110 : index
    %69 = vector.load %arg6[%c0_65, %c110] : memref<8x1280xf32, #tpu.memory_space<vmem>>, vector<8x1024xf32>
    %cst_66 = arith.constant dense<0.000000e+00> : vector<8x1024xf32>
    %70 = tpu.matmul %68, %69, %cst_66 {dimension_numbers = #tpu.dot_dimension_numbers<[1], [0], [0], [1], [0, 0, 1, 1], [], []>} : vector<8x8xf32>, vector<8x1024xf32>, vector<8x1024xf32> -> vector<8x1024xf32>
    %71 = arith.addf %66, %70 : vector<8x1024xf32>
    %c13 = arith.constant 13 : index
    %c0_67 = arith.constant 0 : index
    %c0_68 = arith.constant 0 : index
    %72 = vector.load %arg2[%c13, %c0_67, %c0_68] : memref<27x8x8xf32, #tpu.memory_space<vmem>>, vector<1x8x8xf32>
    %73 = vector.shape_cast %72 : vector<1x8x8xf32> to vector<8x8xf32>
    %c0_69 = arith.constant 0 : index
    %c111 = arith.constant 111 : index
    %74 = vector.load %arg6[%c0_69, %c111] : memref<8x1280xf32, #tpu.memory_space<vmem>>, vector<8x1024xf32>
    %cst_70 = arith.constant dense<0.000000e+00> : vector<8x1024xf32>
    %75 = tpu.matmul %73, %74, %cst_70 {dimension_numbers = #tpu.dot_dimension_numbers<[1], [0], [0], [1], [0, 0, 1, 1], [], []>} : vector<8x8xf32>, vector<8x1024xf32>, vector<8x1024xf32> -> vector<8x1024xf32>
    %76 = arith.addf %71, %75 : vector<8x1024xf32>
    %c14 = arith.constant 14 : index
    %c0_71 = arith.constant 0 : index
    %c0_72 = arith.constant 0 : index
    %77 = vector.load %arg2[%c14, %c0_71, %c0_72] : memref<27x8x8xf32, #tpu.memory_space<vmem>>, vector<1x8x8xf32>
    %78 = vector.shape_cast %77 : vector<1x8x8xf32> to vector<8x8xf32>
    %c0_73 = arith.constant 0 : index
    %c112 = arith.constant 112 : index
    %79 = vector.load %arg6[%c0_73, %c112] : memref<8x1280xf32, #tpu.memory_space<vmem>>, vector<8x1024xf32>
    %cst_74 = arith.constant dense<0.000000e+00> : vector<8x1024xf32>
    %80 = tpu.matmul %78, %79, %cst_74 {dimension_numbers = #tpu.dot_dimension_numbers<[1], [0], [0], [1], [0, 0, 1, 1], [], []>} : vector<8x8xf32>, vector<8x1024xf32>, vector<8x1024xf32> -> vector<8x1024xf32>
    %81 = arith.addf %76, %80 : vector<8x1024xf32>
    %c15 = arith.constant 15 : index
    %c0_75 = arith.constant 0 : index
    %c0_76 = arith.constant 0 : index
    %82 = vector.load %arg2[%c15, %c0_75, %c0_76] : memref<27x8x8xf32, #tpu.memory_space<vmem>>, vector<1x8x8xf32>
    %83 = vector.shape_cast %82 : vector<1x8x8xf32> to vector<8x8xf32>
    %c0_77 = arith.constant 0 : index
    %c120 = arith.constant 120 : index
    %84 = vector.load %arg6[%c0_77, %c120] : memref<8x1280xf32, #tpu.memory_space<vmem>>, vector<8x1024xf32>
    %cst_78 = arith.constant dense<0.000000e+00> : vector<8x1024xf32>
    %85 = tpu.matmul %83, %84, %cst_78 {dimension_numbers = #tpu.dot_dimension_numbers<[1], [0], [0], [1], [0, 0, 1, 1], [], []>} : vector<8x8xf32>, vector<8x1024xf32>, vector<8x1024xf32> -> vector<8x1024xf32>
    %86 = arith.addf %81, %85 : vector<8x1024xf32>
    %c16 = arith.constant 16 : index
    %c0_79 = arith.constant 0 : index
    %c0_80 = arith.constant 0 : index
    %87 = vector.load %arg2[%c16, %c0_79, %c0_80] : memref<27x8x8xf32, #tpu.memory_space<vmem>>, vector<1x8x8xf32>
    %88 = vector.shape_cast %87 : vector<1x8x8xf32> to vector<8x8xf32>
    %c0_81 = arith.constant 0 : index
    %c121 = arith.constant 121 : index
    %89 = vector.load %arg6[%c0_81, %c121] : memref<8x1280xf32, #tpu.memory_space<vmem>>, vector<8x1024xf32>
    %cst_82 = arith.constant dense<0.000000e+00> : vector<8x1024xf32>
    %90 = tpu.matmul %88, %89, %cst_82 {dimension_numbers = #tpu.dot_dimension_numbers<[1], [0], [0], [1], [0, 0, 1, 1], [], []>} : vector<8x8xf32>, vector<8x1024xf32>, vector<8x1024xf32> -> vector<8x1024xf32>
    %91 = arith.addf %86, %90 : vector<8x1024xf32>
    %c17 = arith.constant 17 : index
    %c0_83 = arith.constant 0 : index
    %c0_84 = arith.constant 0 : index
    %92 = vector.load %arg2[%c17, %c0_83, %c0_84] : memref<27x8x8xf32, #tpu.memory_space<vmem>>, vector<1x8x8xf32>
    %93 = vector.shape_cast %92 : vector<1x8x8xf32> to vector<8x8xf32>
    %c0_85 = arith.constant 0 : index
    %c122 = arith.constant 122 : index
    %94 = vector.load %arg6[%c0_85, %c122] : memref<8x1280xf32, #tpu.memory_space<vmem>>, vector<8x1024xf32>
    %cst_86 = arith.constant dense<0.000000e+00> : vector<8x1024xf32>
    %95 = tpu.matmul %93, %94, %cst_86 {dimension_numbers = #tpu.dot_dimension_numbers<[1], [0], [0], [1], [0, 0, 1, 1], [], []>} : vector<8x8xf32>, vector<8x1024xf32>, vector<8x1024xf32> -> vector<8x1024xf32>
    %96 = arith.addf %91, %95 : vector<8x1024xf32>
    %c18 = arith.constant 18 : index
    %c0_87 = arith.constant 0 : index
    %c0_88 = arith.constant 0 : index
    %97 = vector.load %arg2[%c18, %c0_87, %c0_88] : memref<27x8x8xf32, #tpu.memory_space<vmem>>, vector<1x8x8xf32>
    %98 = vector.shape_cast %97 : vector<1x8x8xf32> to vector<8x8xf32>
    %c0_89 = arith.constant 0 : index
    %c200 = arith.constant 200 : index
    %99 = vector.load %arg6[%c0_89, %c200] : memref<8x1280xf32, #tpu.memory_space<vmem>>, vector<8x1024xf32>
    %cst_90 = arith.constant dense<0.000000e+00> : vector<8x1024xf32>
    %100 = tpu.matmul %98, %99, %cst_90 {dimension_numbers = #tpu.dot_dimension_numbers<[1], [0], [0], [1], [0, 0, 1, 1], [], []>} : vector<8x8xf32>, vector<8x1024xf32>, vector<8x1024xf32> -> vector<8x1024xf32>
    %101 = arith.addf %96, %100 : vector<8x1024xf32>
    %c19 = arith.constant 19 : index
    %c0_91 = arith.constant 0 : index
    %c0_92 = arith.constant 0 : index
    %102 = vector.load %arg2[%c19, %c0_91, %c0_92] : memref<27x8x8xf32, #tpu.memory_space<vmem>>, vector<1x8x8xf32>
    %103 = vector.shape_cast %102 : vector<1x8x8xf32> to vector<8x8xf32>
    %c0_93 = arith.constant 0 : index
    %c201 = arith.constant 201 : index
    %104 = vector.load %arg6[%c0_93, %c201] : memref<8x1280xf32, #tpu.memory_space<vmem>>, vector<8x1024xf32>
    %cst_94 = arith.constant dense<0.000000e+00> : vector<8x1024xf32>
    %105 = tpu.matmul %103, %104, %cst_94 {dimension_numbers = #tpu.dot_dimension_numbers<[1], [0], [0], [1], [0, 0, 1, 1], [], []>} : vector<8x8xf32>, vector<8x1024xf32>, vector<8x1024xf32> -> vector<8x1024xf32>
    %106 = arith.addf %101, %105 : vector<8x1024xf32>
    %c20_95 = arith.constant 20 : index
    %c0_96 = arith.constant 0 : index
    %c0_97 = arith.constant 0 : index
    %107 = vector.load %arg2[%c20_95, %c0_96, %c0_97] : memref<27x8x8xf32, #tpu.memory_space<vmem>>, vector<1x8x8xf32>
    %108 = vector.shape_cast %107 : vector<1x8x8xf32> to vector<8x8xf32>
    %c0_98 = arith.constant 0 : index
    %c202 = arith.constant 202 : index
    %109 = vector.load %arg6[%c0_98, %c202] : memref<8x1280xf32, #tpu.memory_space<vmem>>, vector<8x1024xf32>
    %cst_99 = arith.constant dense<0.000000e+00> : vector<8x1024xf32>
    %110 = tpu.matmul %108, %109, %cst_99 {dimension_numbers = #tpu.dot_dimension_numbers<[1], [0], [0], [1], [0, 0, 1, 1], [], []>} : vector<8x8xf32>, vector<8x1024xf32>, vector<8x1024xf32> -> vector<8x1024xf32>
    %111 = arith.addf %106, %110 : vector<8x1024xf32>
    %c21_100 = arith.constant 21 : index
    %c0_101 = arith.constant 0 : index
    %c0_102 = arith.constant 0 : index
    %112 = vector.load %arg2[%c21_100, %c0_101, %c0_102] : memref<27x8x8xf32, #tpu.memory_space<vmem>>, vector<1x8x8xf32>
    %113 = vector.shape_cast %112 : vector<1x8x8xf32> to vector<8x8xf32>
    %c0_103 = arith.constant 0 : index
    %c210 = arith.constant 210 : index
    %114 = vector.load %arg6[%c0_103, %c210] : memref<8x1280xf32, #tpu.memory_space<vmem>>, vector<8x1024xf32>
    %cst_104 = arith.constant dense<0.000000e+00> : vector<8x1024xf32>
    %115 = tpu.matmul %113, %114, %cst_104 {dimension_numbers = #tpu.dot_dimension_numbers<[1], [0], [0], [1], [0, 0, 1, 1], [], []>} : vector<8x8xf32>, vector<8x1024xf32>, vector<8x1024xf32> -> vector<8x1024xf32>
    %116 = arith.addf %111, %115 : vector<8x1024xf32>
    %c22_105 = arith.constant 22 : index
    %c0_106 = arith.constant 0 : index
    %c0_107 = arith.constant 0 : index
    %117 = vector.load %arg2[%c22_105, %c0_106, %c0_107] : memref<27x8x8xf32, #tpu.memory_space<vmem>>, vector<1x8x8xf32>
    %118 = vector.shape_cast %117 : vector<1x8x8xf32> to vector<8x8xf32>
    %c0_108 = arith.constant 0 : index
    %c211 = arith.constant 211 : index
    %119 = vector.load %arg6[%c0_108, %c211] : memref<8x1280xf32, #tpu.memory_space<vmem>>, vector<8x1024xf32>
    %cst_109 = arith.constant dense<0.000000e+00> : vector<8x1024xf32>
    %120 = tpu.matmul %118, %119, %cst_109 {dimension_numbers = #tpu.dot_dimension_numbers<[1], [0], [0], [1], [0, 0, 1, 1], [], []>} : vector<8x8xf32>, vector<8x1024xf32>, vector<8x1024xf32> -> vector<8x1024xf32>
    %121 = arith.addf %116, %120 : vector<8x1024xf32>
    %c23 = arith.constant 23 : index
    %c0_110 = arith.constant 0 : index
    %c0_111 = arith.constant 0 : index
    %122 = vector.load %arg2[%c23, %c0_110, %c0_111] : memref<27x8x8xf32, #tpu.memory_space<vmem>>, vector<1x8x8xf32>
    %123 = vector.shape_cast %122 : vector<1x8x8xf32> to vector<8x8xf32>
    %c0_112 = arith.constant 0 : index
    %c212 = arith.constant 212 : index
    %124 = vector.load %arg6[%c0_112, %c212] : memref<8x1280xf32, #tpu.memory_space<vmem>>, vector<8x1024xf32>
    %cst_113 = arith.constant dense<0.000000e+00> : vector<8x1024xf32>
    %125 = tpu.matmul %123, %124, %cst_113 {dimension_numbers = #tpu.dot_dimension_numbers<[1], [0], [0], [1], [0, 0, 1, 1], [], []>} : vector<8x8xf32>, vector<8x1024xf32>, vector<8x1024xf32> -> vector<8x1024xf32>
    %126 = arith.addf %121, %125 : vector<8x1024xf32>
    %c24 = arith.constant 24 : index
    %c0_114 = arith.constant 0 : index
    %c0_115 = arith.constant 0 : index
    %127 = vector.load %arg2[%c24, %c0_114, %c0_115] : memref<27x8x8xf32, #tpu.memory_space<vmem>>, vector<1x8x8xf32>
    %128 = vector.shape_cast %127 : vector<1x8x8xf32> to vector<8x8xf32>
    %c0_116 = arith.constant 0 : index
    %c220 = arith.constant 220 : index
    %129 = vector.load %arg6[%c0_116, %c220] : memref<8x1280xf32, #tpu.memory_space<vmem>>, vector<8x1024xf32>
    %cst_117 = arith.constant dense<0.000000e+00> : vector<8x1024xf32>
    %130 = tpu.matmul %128, %129, %cst_117 {dimension_numbers = #tpu.dot_dimension_numbers<[1], [0], [0], [1], [0, 0, 1, 1], [], []>} : vector<8x8xf32>, vector<8x1024xf32>, vector<8x1024xf32> -> vector<8x1024xf32>
    %131 = arith.addf %126, %130 : vector<8x1024xf32>
    %c25 = arith.constant 25 : index
    %c0_118 = arith.constant 0 : index
    %c0_119 = arith.constant 0 : index
    %132 = vector.load %arg2[%c25, %c0_118, %c0_119] : memref<27x8x8xf32, #tpu.memory_space<vmem>>, vector<1x8x8xf32>
    %133 = vector.shape_cast %132 : vector<1x8x8xf32> to vector<8x8xf32>
    %c0_120 = arith.constant 0 : index
    %c221 = arith.constant 221 : index
    %134 = vector.load %arg6[%c0_120, %c221] : memref<8x1280xf32, #tpu.memory_space<vmem>>, vector<8x1024xf32>
    %cst_121 = arith.constant dense<0.000000e+00> : vector<8x1024xf32>
    %135 = tpu.matmul %133, %134, %cst_121 {dimension_numbers = #tpu.dot_dimension_numbers<[1], [0], [0], [1], [0, 0, 1, 1], [], []>} : vector<8x8xf32>, vector<8x1024xf32>, vector<8x1024xf32> -> vector<8x1024xf32>
    %136 = arith.addf %131, %135 : vector<8x1024xf32>
    %c26 = arith.constant 26 : index
    %c0_122 = arith.constant 0 : index
    %c0_123 = arith.constant 0 : index
    %137 = vector.load %arg2[%c26, %c0_122, %c0_123] : memref<27x8x8xf32, #tpu.memory_space<vmem>>, vector<1x8x8xf32>
    %138 = vector.shape_cast %137 : vector<1x8x8xf32> to vector<8x8xf32>
    %c0_124 = arith.constant 0 : index
    %c222 = arith.constant 222 : index
    %139 = vector.load %arg6[%c0_124, %c222] : memref<8x1280xf32, #tpu.memory_space<vmem>>, vector<8x1024xf32>
    %cst_125 = arith.constant dense<0.000000e+00> : vector<8x1024xf32>
    %140 = tpu.matmul %138, %139, %cst_125 {dimension_numbers = #tpu.dot_dimension_numbers<[1], [0], [0], [1], [0, 0, 1, 1], [], []>} : vector<8x8xf32>, vector<8x1024xf32>, vector<8x1024xf32> -> vector<8x1024xf32>
    %141 = arith.addf %136, %140 : vector<8x1024xf32>
    %c0_126 = arith.constant 0 : index
    %c0_127 = arith.constant 0 : index
    %c0_128 = arith.constant 0 : index
    %142 = vector.load %arg5[%c0_126, %c0_127, %c0_128] : memref<1x8x1024xf32, #tpu.memory_space<vmem>>, vector<1x8x1024xf32>
    %143 = vector.shape_cast %142 : vector<1x8x1024xf32> to vector<8x1024xf32>
    %144 = vector.shape_cast %141 : vector<8x1024xf32> to vector<1x8x1024xf32>
    tpu.vector_store %arg5[%c0_126, %c0_127, %c0_128], %144 {strides = array<i32>} : memref<1x8x1024xf32, #tpu.memory_space<vmem>>, vector<1x8x1024xf32>,
    return
  }
  func.func @transform_0(%arg0: i32, %arg1: i32) -> (i32, i32, i32) {
    %c0_i32 = arith.constant 0 : i32
    %c0_i32_0 = arith.constant 0 : i32
    %c0_i32_1 = arith.constant 0 : i32
    %c0_i32_2 = arith.constant 0 : i32
    return %c0_i32, %c0_i32_0, %c0_i32_1 : i32, i32, i32
  }
  func.func @transform_1(%arg0: i32, %arg1: i32) -> (i32, i32, i32) {
    %c0_i32 = arith.constant 0 : i32
    %c0_i32_0 = arith.constant 0 : i32
    return %arg0, %c0_i32, %arg1 : i32, i32, i32
  }
  func.func @transform_2(%arg0: i32, %arg1: i32) -> (i32, i32, i32) {
    %c1_i32 = arith.constant 1 : i32
    %0 = arith.addi %arg1, %c1_i32 : i32
    %c4_i32 = arith.constant 4 : i32
    %1 = arith.muli %0, %c4_i32 : i32
    %c0_i32 = arith.constant 0 : i32
    %c0_i32_0 = arith.constant 0 : i32
    return %arg0, %c0_i32, %1 : i32, i32, i32
  }
  func.func @transform_3(%arg0: i32, %arg1: i32) -> (i32, i32, i32) {
    %c0_i32 = arith.constant 0 : i32
    %c0_i32_0 = arith.constant 0 : i32
    return %arg0, %c0_i32, %arg1 : i32, i32, i32
  }
}

</mosaic_0001>

<bundles_post_ra>
// kernel: linear_kernel_forward.1
= control target key start
LH: loop header
LB: loop body
LE: loop exit
PB: predicated region body
PF: predicated region fallthrough
CT: control target
= control target key end

     0   :  { %s9651_s12 = smov 0   ;;  %s9653_s13 = smov 0   ;;  %s10965_s0 = inlined_call_operand.vmem [shape: f32[27,8,8], index: 0, kind: input, shape index: {}]   ;;  %s10966_s1 = inlined_call_operand.vmem [shape: f32[2,8,1280], index: 1, kind: input, shape index: {}, may-alias: {1,2}]   ;;  %s10967_s2 = inlined_call_operand.vmem [shape: f32[2,8,1280], index: 2, kind: input, shape index: {}, may-alias: {1,2}]   ;;  %s10968_s3 = inlined_call_operand.vmem [shape: f32[2,8,1024], index: 3, kind: output, shape index: {}]  }
   0x1   :  { %s9655_s14 = smov 0  }
   0x2 LB: > { %s25_s15 = sadd.s32 1, %s9598_s13  ;;  %p9365_p0 = scmp.ge.s32.totalorder %s9602_s14, 1  ;;  %s9602_s14 = sphi %s9655_s14, %s13_s14   ;;  %s9598_s13 = sphi %s9653_s13, %s11010_s13   ;;  %s9594_s12 = sphi %s9651_s12, %s11009_s12  }
   0x3   : > { %p27_p1 = scmp.ge.s32.totalorder %s25_s15, 2  ;;  %p191_p2 = scmp.lt.s32.totalorder %s9602_s14, 3 }
   0x5   : > { %s11012_s15 = smov (%p27_p1, %s25_s15), 0  ;;  %p192_p3 = pnand %p9365_p0, %p191_p2 }
   0x7   : > { %195 = sbr.rel (%p192_p3) target bundleno = 802 (0x322), region = 32 }
   0xc   : > { %p243_p4 = scmp.lt.s32.totalorder %s9594_s12, 1  ;;  %v9604_v0 = vmov 0.0   ;;  %s9605_s20 = smov 127   ;;  %vm339_vm0 = vcmask 1039360   ;;  %v9370_v19 = vld [vmem:[%s10965_s0 + $0x8] sm:$0xff]  ;;  %vm356_vm1 = vcmask 64512  }
   0xd   : > { %424 = vmatprep.mubr.f32.mxu0 %v9604_v0  ;;  %495 = vmatprep.mubr.f32.mxu1 %v9604_v0  ;;  %s9606_s25 = smov 126   ;;  %s9607_s26 = smov 118   ;;  %vm951_vm2 = vcmask 1031168   ;;  %v300_v29 = vld [vmem:[%s10965_s0] sm:$0xff]  ;;  %v9379_v41 = vld [vmem:[%s10965_s0 + $0x10] sm:$0xff]  ;;  %vm1283_vm3 = vcmask 965632  }
   0xe   : > { %s11014_s12 = smov (!%p243_p4, %s9594_s12), 1  ;;  %s9608_s27 = smov 117   ;;  %v9384_v54 = vld [vmem:[%s10965_s0 + $0x18] sm:$0xff]  ;;  %vm1615_vm4 = vcmask 957440   ;;  %vm1947_vm5 = vcmask 949248   ;;  %vm2279_vm6 = vcmask 883712  }
   0xf   : > { %s9509_s16 = smul.u32 80, %s11014_s12  ;;  %s9609_s28 = smov 116   ;;  %vm2611_vm7 = vcmask 875520   ;;  %vm2943_vm8 = vcmask 867328   ;;  %vm3275_vm9 = vcmask 228352   ;;  %vm3607_vm10 = vcmask 220160  }
  0x10   : > { %s9610_s29 = smov 108   ;;  %s9611_s30 = smov 107   ;;  %vm3939_vm11 = vcmask 211968   ;;  %vm4271_vm12 = vcmask 146432   ;;  %vm4603_vm13 = vcmask 138240   ;;  %vm4935_vm14 = vcmask 130048  }
  0x11   : > { %s9675_s19 = scalar_lea.vmem %s10966_s1, %s9509_s16  ;;  %s9507_s21 = sadd.s32 64, %s9509_s16  ;;  %vm5598_vm15 = vcmask 56320  }
  0x12   : > { %v9680_v1 = vld [vmem:[%s9675_s19 + $0x18] sm:$0xff]  ;;  %v9683_v2 = vld [vmem:[%s9675_s19 + $0x8] sm:$0xff]  ;;  %v9688_v3 = vld [vmem:[%s9675_s19 + $0x20] sm:$0xff]  ;;  %s9712_s24 = scalar_lea.vmem %s10967_s2, %s9507_s21  ;;  %s9612_s6 = smov 106  }
  0x13   : > { %327 = vrot.lane.b32.xlu1 %v9680_v1, %s9605_s20  ;;  %323 = vrot.lane.b32.xlu0 %v9683_v2, %s9605_s20  ;;  %v9691_v4 = vld [vmem:[%s9675_s19 + $0x10] sm:$0xff]  ;;  %v9696_v5 = vld [vmem:[%s9675_s19 + $0x28] sm:$0xff]  ;;  %s9613_s11 = smov 28   ;;  %s9614_s18 = smov 27  }
  0x14   : > { %v9699_v6 = vld [vmem:[%s9675_s19] sm:$0xff]  ;;  %v9704_v7 = vld [vmem:[%s9675_s19 + $0x38] sm:$0xff]  ;;  %v9707_v8 = vld [vmem:[%s9675_s19 + $0x30] sm:$0xff]  ;;  %s9615_s22 = smov 26   ;;  %s9618_s5 = smov 16  }
  0x15   : > { %v9717_v9 = vld [vmem:[%s9712_s24] sm:$0xff]  ;;  %s9619_s8 = smov 8   ;;  %s9508_s16 = sshll.u32 %s11014_s12, 6 }
  0x17   : > { %329 = vrot.lane.b32.xlu1 %v9688_v3, %s9605_s20  ;;  %325 = vrot.lane.b32.xlu0 %v9691_v4, %s9605_s20 }
  0x1b   : > { %331 = vrot.lane.b32.xlu1 %v9696_v5, %s9605_s20  ;;  %321 = vrot.lane.b32.xlu0 %v9699_v6, %s9605_s20 }
  0x1f   : > { %335 = vrot.lane.b32.xlu1 %v9704_v7, %s9605_s20  ;;  %333 = vrot.lane.b32.xlu0 %v9707_v8, %s9605_s20 }
  0x23   : > { %935 = vrot.lane.b32.xlu1 %v9683_v2, %s9606_s25  ;;  %337 = vrot.lane.b32.xlu0 %v9717_v9, %s9605_s20 }
  0x27   : > { %939 = vrot.lane.b32.xlu1 %v9680_v1, %s9606_s25  ;;  %937 = vrot.lane.b32.xlu0 %v9691_v4, %s9606_s25 }
  0x2b   : > { %933 = vrot.lane.b32.xlu1 %v9699_v6, %s9606_s25  ;;  %941 = vrot.lane.b32.xlu0 %v9688_v3, %s9606_s25 }
  0x2f   : > { %945 = vrot.lane.b32.xlu1 %v9707_v8, %s9606_s25  ;;  %943 = vrot.lane.b32.xlu0 %v9696_v5, %s9606_s25 }
  0x33   : > { %949 = vrot.lane.b32.xlu1 %v9717_v9, %s9606_s25  ;;  %947 = vrot.lane.b32.xlu0 %v9704_v7, %s9606_s25 }
  0x37   : > { %1269 = vrot.lane.b32.xlu1 %v9691_v4, %s9607_s26  ;;  %1267 = vrot.lane.b32.xlu0 %v9683_v2, %s9607_s26 }
  0x3b   : > { %1273 = vrot.lane.b32.xlu1 %v9688_v3, %s9607_s26  ;;  %1271 = vrot.lane.b32.xlu0 %v9680_v1, %s9607_s26 }
  0x3f   : > { %1275 = vrot.lane.b32.xlu1 %v9696_v5, %s9607_s26  ;;  %1265 = vrot.lane.b32.xlu0 %v9699_v6, %s9607_s26 }
  0x43   : > { %1279 = vrot.lane.b32.xlu1 %v9704_v7, %s9607_s26  ;;  %1277 = vrot.lane.b32.xlu0 %v9707_v8, %s9607_s26 }
  0x47   : > { %1599 = vrot.lane.b32.xlu1 %v9683_v2, %s9608_s27  ;;  %1281 = vrot.lane.b32.xlu0 %v9717_v9, %s9607_s26  ;;  %s9616_s26 = smov 18  }
  0x4b   : > { %1603 = vrot.lane.b32.xlu1 %v9680_v1, %s9608_s27  ;;  %1601 = vrot.lane.b32.xlu0 %v9691_v4, %s9608_s27 }
  0x4f   : > { %1597 = vrot.lane.b32.xlu1 %v9699_v6, %s9608_s27  ;;  %1605 = vrot.lane.b32.xlu0 %v9688_v3, %s9608_s27 }
  0x53   : > { %1609 = vrot.lane.b32.xlu1 %v9707_v8, %s9608_s27  ;;  %1607 = vrot.lane.b32.xlu0 %v9696_v5, %s9608_s27 }
  0x57   : > { %1613 = vrot.lane.b32.xlu1 %v9717_v9, %s9608_s27  ;;  %1611 = vrot.lane.b32.xlu0 %v9704_v7, %s9608_s27 }
  0x5b   : > { %1933 = vrot.lane.b32.xlu1 %v9691_v4, %s9609_s28  ;;  %1931 = vrot.lane.b32.xlu0 %v9683_v2, %s9609_s28 }
  0x5f   : > { %1937 = vrot.lane.b32.xlu1 %v9688_v3, %s9609_s28  ;;  %1935 = vrot.lane.b32.xlu0 %v9680_v1, %s9609_s28 }
  0x63   : > { %1939 = vrot.lane.b32.xlu1 %v9696_v5, %s9609_s28  ;;  %1929 = vrot.lane.b32.xlu0 %v9699_v6, %s9609_s28 }
  0x67   : > { %1943 = vrot.lane.b32.xlu1 %v9704_v7, %s9609_s28  ;;  %1941 = vrot.lane.b32.xlu0 %v9707_v8, %s9609_s28 }
  0x6b   : > { %2263 = vrot.lane.b32.xlu1 %v9683_v2, %s9610_s29  ;;  %1945 = vrot.lane.b32.xlu0 %v9717_v9, %s9609_s28 }
  0x6f   : > { %2267 = vrot.lane.b32.xlu1 %v9680_v1, %s9610_s29  ;;  %2265 = vrot.lane.b32.xlu0 %v9691_v4, %s9610_s29 }
  0x73   : > { %2261 = vrot.lane.b32.xlu1 %v9699_v6, %s9610_s29  ;;  %2269 = vrot.lane.b32.xlu0 %v9688_v3, %s9610_s29 }
  0x77   : > { %2273 = vrot.lane.b32.xlu1 %v9707_v8, %s9610_s29  ;;  %2271 = vrot.lane.b32.xlu0 %v9696_v5, %s9610_s29 }
  0x7b   : > { %2277 = vrot.lane.b32.xlu1 %v9717_v9, %s9610_s29  ;;  %2275 = vrot.lane.b32.xlu0 %v9704_v7, %s9610_s29  ;;  %s9617_s29 = smov 17  }
  0x7f   : > { %2597 = vrot.lane.b32.xlu1 %v9691_v4, %s9611_s30  ;;  %2595 = vrot.lane.b32.xlu0 %v9683_v2, %s9611_s30 }
  0x83   : > { %2601 = vrot.lane.b32.xlu1 %v9688_v3, %s9611_s30  ;;  %2599 = vrot.lane.b32.xlu0 %v9680_v1, %s9611_s30 }
  0x85   : > { %v328_v10 = vpop.permute.xlu1 %327  ;;  %v324_v11 = vpop.permute.xlu0 %323 }
  0x87   : > { %2603 = vrot.lane.b32.xlu1 %v9696_v5, %s9611_s30  ;;  %2593 = vrot.lane.b32.xlu0 %v9699_v6, %s9611_s30 }
  0x89   : > { %v330_v12 = vpop.permute.xlu1 %329  ;;  %v326_v13 = vpop.permute.xlu0 %325 }
  0x8a   : > { %v341_v14 = vsel %vm339_vm0, %v324_v11, %v326_v13  ;;  %v343_v15 = vsel %vm339_vm0, %v328_v10, %v330_v12  ;;  %v342_v16 = vsel %vm339_vm0, %v326_v13, %v328_v10 }
  0x8b   : > { %390 = vmatprep.subr.mxu0 %v341_v14  ;;  %461 = vmatprep.subr.mxu1 %v343_v15 }
  0x8c   : > { %2607 = vrot.lane.b32.xlu1 %v9704_v7, %s9611_s30  ;;  %2605 = vrot.lane.b32.xlu0 %v9707_v8, %s9611_s30 }
  0x8d   : > { %462 = vmatpush1.msra.mxu1 %v342_v16  ;;  %v332_v17 = vpop.permute.xlu1 %331  ;;  %v322_v18 = vpop.permute.xlu0 %321 }
  0x8e   : > { %v340_v20 = vsel %vm339_vm0, %v322_v18, %v324_v11  ;;  %9372 = vmatmul.mubr.msk.f32.vlgmr.msra.gmra.mxu1 %vm356_vm1, %v9370_v19  ;;  %v344_v24 = vsel %vm339_vm0, %v330_v12, %v332_v17 }
  0x8f   : > { %391 = vmatpush1.msra.mxu0 %v340_v20  ;;  %637 = vmatprep.mubr.f32.mxu1 %v9604_v0 }
  0x90   : > { %2927 = vrot.lane.b32.xlu1 %v9683_v2, %s9612_s6  ;;  %2609 = vrot.lane.b32.xlu0 %v9717_v9, %s9611_s30 }
  0x91   : > { %v336_v21 = vpop.permute.xlu1 %335  ;;  %v334_v22 = vpop.permute.xlu0 %333  ;;  %9371 = vmatmul.mubr.msk.f32.vlgmr.msra.gmra.mxu0 %vm356_vm1, %v9370_v19 }
  0x92   : > { %v345_v23 = vsel %vm339_vm0, %v332_v17, %v334_v22  ;;  %566 = vmatprep.mubr.f32.mxu0 %v9604_v0  ;;  %v346_v28 = vsel %vm339_vm0, %v334_v22, %v336_v21  ;;  %v9389_v17 = vld [vmem:[%s10965_s0 + $0x20] sm:$0xff] }
  0x93   : > { %532 = vmatprep.subr.mxu0 %v345_v23 }
  0x94   : > { %2931 = vrot.lane.b32.xlu1 %v9680_v1, %s9612_s6  ;;  %2929 = vrot.lane.b32.xlu0 %v9691_v4, %s9612_s6 }
  0x95   : > { %533 = vmatpush1.msra.mxu0 %v344_v24  ;;  %v936_v25 = vpop.permute.xlu1 %935  ;;  %v338_v26 = vpop.permute.xlu0 %337 }
  0x96   : > { %9373 = vmatmul.mubr.msk.f32.vlgmr.msra.gmra.mxu0 %vm356_vm1, %v9370_v19  ;;  %v347_v27 = vsel %vm339_vm0, %v336_v21, %v338_v26  ;;  %677 = vmatprep.subr.mxu0 %v9683_v2  ;;  %vm5930_vm0 = vcmask 48128  }
  0x97   : > { %603 = vmatprep.subr.mxu1 %v347_v27  ;;  %678 = vmatpush1.msra.mxu0 %v9699_v6 }
  0x98   : > { %2925 = vrot.lane.b32.xlu1 %v9699_v6, %s9612_s6  ;;  %2933 = vrot.lane.b32.xlu0 %v9688_v3, %s9612_s6 }
  0x99   : > { %604 = vmatpush1.msra.mxu1 %v346_v28  ;;  %v940_v30 = vpop.permute.xlu1 %939  ;;  %711 = vmatprep.mubr.f32.mxu0 %v9604_v0  ;;  %v938_v31 = vpop.permute.xlu0 %937 }
  0x9a   : > { %9374 = vmatmul.mubr.msk.f32.vlgmr.msra.gmra.mxu1 %vm356_vm1, %v9370_v19  ;;  %819 = vmatprep.subr.mxu0 %v9696_v5  ;;  %v953_v32 = vsel %vm951_vm2, %v936_v25, %v938_v31  ;;  %v954_v40 = vsel %vm951_vm2, %v938_v31, %v940_v30 }
  0x9b   : > { %9375 = vmatmul.mubr.msk.f32.vlgmr.msra.gmra.mxu0 %vm356_vm1, %v300_v29  ;;  %748 = vmatprep.subr.mxu1 %v9680_v1 }
  0x9c   : > { %820 = vmatpush1.msra.mxu0 %v9688_v3  ;;  %2937 = vrot.lane.b32.xlu1 %v9707_v8, %s9612_s6 }
  0x9d   : > { %2935 = vrot.lane.b32.xlu0 %v9696_v5, %s9612_s6  ;;  %1001 = vmatprep.subr.mxu0 %v953_v32  ;;  %v934_v33 = vpop.permute.xlu1 %933  ;;  %v942_v34 = vpop.permute.xlu0 %941 }
  0x9e   : > { %749 = vmatpush1.msra.mxu1 %v9691_v4  ;;  %782 = vmatprep.mubr.f32.mxu1 %v9604_v0  ;;  %v955_v35 = vsel %vm951_vm2, %v940_v30, %v942_v34  ;;  %v952_v36 = vsel %vm951_vm2, %v934_v33, %v936_v25 }
  0x9f   : > { %9376 = vmatmul.mubr.msk.f32.vlgmr.msra.gmra.mxu1 %vm356_vm1, %v300_v29  ;;  %890 = vmatprep.subr.mxu1 %v9704_v7 }
  0xa0   : > { %853 = vmatprep.mubr.f32.mxu0 %v9604_v0  ;;  %891 = vmatpush1.msra.mxu1 %v9707_v8 }
  0xa1   : > { %2941 = vrot.lane.b32.xlu1 %v9717_v9, %s9612_s6  ;;  %2939 = vrot.lane.b32.xlu0 %v9704_v7, %s9612_s6  ;;  %v946_v37 = vpop.permute.xlu1 %945  ;;  %v944_v38 = vpop.permute.xlu0 %943 }
  0xa2   : > { %9377 = vmatmul.mubr.msk.f32.vlgmr.msra.gmra.mxu0 %vm356_vm1, %v300_v29  ;;  %1072 = vmatprep.subr.mxu1 %v955_v35  ;;  %v957_v39 = vsel %vm951_vm2, %v944_v38, %v946_v37  ;;  %v956_v42 = vsel %vm951_vm2, %v942_v34, %v944_v38 }
  0xa3   : > { %1002 = vmatpush1.msra.mxu0 %v952_v36  ;;  %924 = vmatprep.mubr.f32.mxu1 %v9604_v0  ;;  %v9394_v36 = vld [vmem:[%s10965_s0 + $0x28] sm:$0xff] }
  0xa4   : > { %9378 = vmatmul.mubr.msk.f32.vlgmr.msra.gmra.mxu1 %vm356_vm1, %v300_v29  ;;  %1035 = vmatprep.mubr.f32.mxu0 %v9604_v0 }
  0xa5   : > { %1073 = vmatpush1.msra.mxu1 %v954_v40  ;;  %3261 = vrot.lane.b32.xlu1 %v9691_v4, %s9613_s11  ;;  %v950_v43 = vpop.permute.xlu1 %949  ;;  %v948_v44 = vpop.permute.xlu0 %947 }
  0xa6   : > { %3259 = vrot.lane.b32.xlu0 %v9683_v2, %s9613_s11  ;;  %1143 = vmatprep.subr.mxu0 %v957_v39  ;;  %v959_v45 = vsel %vm951_vm2, %v948_v44, %v950_v43  ;;  %v958_v46 = vsel %vm951_vm2, %v946_v37, %v948_v44  ;;  %vm6280_vm2 = vcmask 457728  }
  0xa7   : > { %9380 = vmatmul.mubr.msk.f32.vlgmr.msra.gmra.mxu0 %vm356_vm1, %v9379_v41  ;;  %1106 = vmatprep.mubr.f32.mxu1 %v9604_v0 }
  0xa8   : > { %1144 = vmatpush1.msra.mxu0 %v956_v42  ;;  %1214 = vmatprep.subr.mxu1 %v959_v45 }
  0xa9   : > { %3265 = vrot.lane.b32.xlu1 %v9688_v3, %s9613_s11  ;;  %9381 = vmatmul.mubr.msk.f32.vlgmr.msra.gmra.mxu1 %vm356_vm1, %v9379_v41  ;;  %v1270_v47 = vpop.permute.xlu1 %1269  ;;  %v1268_v48 = vpop.permute.xlu0 %1267 }
  0xaa   : > { %3263 = vrot.lane.b32.xlu0 %v9680_v1, %s9613_s11  ;;  %1215 = vmatpush1.msra.mxu1 %v958_v46  ;;  %v1285_v49 = vsel %vm1283_vm3, %v1268_v48, %v1270_v47 }
  0xab   : > { %1333 = vmatprep.subr.mxu0 %v1285_v49  ;;  %1248 = vmatprep.mubr.f32.mxu1 %v9604_v0 }
  0xac   : > { %1177 = vmatprep.mubr.f32.mxu0 %v9604_v0 }
  0xad   : > { %3267 = vrot.lane.b32.xlu1 %v9696_v5, %s9613_s11  ;;  %v1274_v50 = vpop.permute.xlu1 %1273  ;;  %v1272_v51 = vpop.permute.xlu0 %1271  ;;  %9383 = vmatmul.mubr.msk.f32.vlgmr.msra.gmra.mxu1 %vm356_vm1, %v9379_v41 }
  0xae   : > { %3257 = vrot.lane.b32.xlu0 %v9699_v6, %s9613_s11  ;;  %v1287_v52 = vsel %vm1283_vm3, %v1272_v51, %v1274_v50  ;;  %v1286_v53 = vsel %vm1283_vm3, %v1270_v47, %v1272_v51  ;;  %9382 = vmatmul.mubr.msk.f32.vlgmr.msra.gmra.mxu0 %vm356_vm1, %v9379_v41 }
  0xaf   : > { %1404 = vmatprep.subr.mxu1 %v1287_v52  ;;  %1367 = vmatprep.mubr.f32.mxu0 %v9604_v0 }
  0xb0   : > { %1405 = vmatpush1.msra.mxu1 %v1286_v53  ;;  %1438 = vmatprep.mubr.f32.mxu1 %v9604_v0  ;;  %v9399_v53 = vld [vmem:[%s10965_s0 + $0x30] sm:$0xff] }
  0xb1   : > { %3271 = vrot.lane.b32.xlu1 %v9704_v7, %s9613_s11  ;;  %v1276_v55 = vpop.permute.xlu1 %1275  ;;  %v1266_v56 = vpop.permute.xlu0 %1265  ;;  %9386 = vmatmul.mubr.msk.f32.vlgmr.msra.gmra.mxu1 %vm356_vm1, %v9384_v54 }
  0xb2   : > { %3269 = vrot.lane.b32.xlu0 %v9707_v8, %s9613_s11  ;;  %v1284_v57 = vsel %vm1283_vm3, %v1266_v56, %v1268_v48  ;;  %1580 = vmatprep.mubr.f32.mxu1 %v9604_v0  ;;  %v1288_v61 = vsel %vm1283_vm3, %v1274_v50, %v1276_v55 }
  0xb3   : > { %1334 = vmatpush1.msra.mxu0 %v1284_v57 }
  0xb4   : > { %9385 = vmatmul.mubr.msk.f32.vlgmr.msra.gmra.mxu0 %vm356_vm1, %v9384_v54 }
  0xb5   : > { %3591 = vrot.lane.b32.xlu1 %v9683_v2, %s9614_s18  ;;  %v1280_v58 = vpop.permute.xlu1 %1279  ;;  %v1278_v59 = vpop.permute.xlu0 %1277  ;;  %1509 = vmatprep.mubr.f32.mxu0 %v9604_v0 }
  0xb6   : > { %3273 = vrot.lane.b32.xlu0 %v9717_v9, %s9613_s11  ;;  %v1289_v60 = vsel %vm1283_vm3, %v1276_v55, %v1278_v59  ;;  %v1290_v11 = vsel %vm1283_vm3, %v1278_v59, %v1280_v58  ;;  %s9620_s11 = smov 7  }
  0xb7   : > { %1475 = vmatprep.subr.mxu0 %v1289_v60 }
  0xb8   : > { %1476 = vmatpush1.msra.mxu0 %v1288_v61 }
  0xb9   : > { %3595 = vrot.lane.b32.xlu1 %v9680_v1, %s9614_s18  ;;  %v1600_v62 = vpop.permute.xlu1 %1599  ;;  %v1282_v63 = vpop.permute.xlu0 %1281  ;;  %9387 = vmatmul.mubr.msk.f32.vlgmr.msra.gmra.mxu0 %vm356_vm1, %v9384_v54 }
  0xba   : > { %3593 = vrot.lane.b32.xlu0 %v9691_v4, %s9614_s18  ;;  %v1291_v10 = vsel %vm1283_vm3, %v1280_v58, %v1282_v63  ;;  %1699 = vmatprep.mubr.f32.mxu0 %v9604_v0  ;;  %vm6612_vm3 = vcmask 449536  }
  0xbb   : > { %1546 = vmatprep.subr.mxu1 %v1291_v10 }
  0xbc   : > { %1547 = vmatpush1.msra.mxu1 %v1290_v11 }
  0xbd   : > { %3589 = vrot.lane.b32.xlu1 %v9699_v6, %s9614_s18  ;;  %v1604_v12 = vpop.permute.xlu1 %1603  ;;  %v1602_v13 = vpop.permute.xlu0 %1601  ;;  %9388 = vmatmul.mubr.msk.f32.vlgmr.msra.gmra.mxu1 %vm356_vm1, %v9384_v54 }
  0xbe   : > { %3597 = vrot.lane.b32.xlu0 %v9688_v3, %s9614_s18  ;;  %v1617_v14 = vsel %vm1615_vm4, %v1600_v62, %v1602_v13  ;;  %1770 = vmatprep.mubr.f32.mxu1 %v9604_v0  ;;  %v1618_v20 = vsel %vm1615_vm4, %v1602_v13, %v1604_v12 }
  0xbf   : > { %1665 = vmatprep.subr.mxu0 %v1617_v14 }
  0xc1   : > { %3601 = vrot.lane.b32.xlu1 %v9707_v8, %s9614_s18  ;;  %v1598_v15 = vpop.permute.xlu1 %1597  ;;  %v1606_v16 = vpop.permute.xlu0 %1605 }
  0xc2   : > { %3599 = vrot.lane.b32.xlu0 %v9696_v5, %s9614_s18  ;;  %v1616_v18 = vsel %vm1615_vm4, %v1598_v15, %v1600_v62  ;;  %v1619_v19 = vsel %vm1615_vm4, %v1604_v12, %v1606_v16 }
  0xc3   : > { %1666 = vmatpush1.msra.mxu0 %v1616_v18  ;;  %1736 = vmatprep.subr.mxu1 %v1619_v19  ;;  %v9404_v18 = vld [vmem:[%s10965_s0 + $0x38] sm:$0xff] }
  0xc4   : > { %1737 = vmatpush1.msra.mxu1 %v1618_v20  ;;  %9390 = vmatmul.mubr.msk.f32.vlgmr.msra.gmra.mxu0 %vm356_vm1, %v9389_v17 }
  0xc5   : > { %3605 = vrot.lane.b32.xlu1 %v9717_v9, %s9614_s18  ;;  %v1610_v21 = vpop.permute.xlu1 %1609  ;;  %v1608_v22 = vpop.permute.xlu0 %1607  ;;  %9391 = vmatmul.mubr.msk.f32.vlgmr.msra.gmra.mxu1 %vm356_vm1, %v9389_v17 }
  0xc6   : > { %3603 = vrot.lane.b32.xlu0 %v9704_v7, %s9614_s18  ;;  %v1621_v23 = vsel %vm1615_vm4, %v1608_v22, %v1610_v21  ;;  %v1620_v24 = vsel %vm1615_vm4, %v1606_v16, %v1608_v22  ;;  %1912 = vmatprep.mubr.f32.mxu1 %v9604_v0  ;;  %s9621_s18 = smov 6  }
  0xc7   : > { %1807 = vmatprep.subr.mxu0 %v1621_v23  ;;  %1841 = vmatprep.mubr.f32.mxu0 %v9604_v0 }
  0xc8   : > { %1808 = vmatpush1.msra.mxu0 %v1620_v24 }
  0xc9   : > { %3925 = vrot.lane.b32.xlu1 %v9691_v4, %s9615_s22  ;;  %v1614_v25 = vpop.permute.xlu1 %1613  ;;  %v1612_v26 = vpop.permute.xlu0 %1611  ;;  %9392 = vmatmul.mubr.msk.f32.vlgmr.msra.gmra.mxu0 %vm356_vm1, %v9389_v17 }
  0xca   : > { %3923 = vrot.lane.b32.xlu0 %v9683_v2, %s9615_s22  ;;  %v1623_v27 = vsel %vm1615_vm4, %v1612_v26, %v1614_v25  ;;  %v1622_v28 = vsel %vm1615_vm4, %v1610_v21, %v1612_v26  ;;  %2031 = vmatprep.mubr.f32.mxu0 %v9604_v0  ;;  %vm6944_vm4 = vcmask 441344  }
  0xcb   : > { %1878 = vmatprep.subr.mxu1 %v1623_v27 }
  0xcc   : > { %1879 = vmatpush1.msra.mxu1 %v1622_v28 }
  0xcd   : > { %3929 = vrot.lane.b32.xlu1 %v9688_v3, %s9615_s22  ;;  %v1934_v29 = vpop.permute.xlu1 %1933  ;;  %v1932_v30 = vpop.permute.xlu0 %1931  ;;  %9393 = vmatmul.mubr.msk.f32.vlgmr.msra.gmra.mxu1 %vm356_vm1, %v9389_v17 }
  0xce   : > { %3927 = vrot.lane.b32.xlu0 %v9680_v1, %s9615_s22  ;;  %v1949_v31 = vsel %vm1947_vm5, %v1932_v30, %v1934_v29  ;;  %2102 = vmatprep.mubr.f32.mxu1 %v9604_v0 }
  0xcf   : > { %1997 = vmatprep.subr.mxu0 %v1949_v31 }
  0xd1   : > { %3931 = vrot.lane.b32.xlu1 %v9696_v5, %s9615_s22  ;;  %v1938_v32 = vpop.permute.xlu1 %1937  ;;  %v1936_v33 = vpop.permute.xlu0 %1935 }
  0xd2   : > { %3921 = vrot.lane.b32.xlu0 %v9699_v6, %s9615_s22  ;;  %v1951_v34 = vsel %vm1947_vm5, %v1936_v33, %v1938_v32  ;;  %v1950_v35 = vsel %vm1947_vm5, %v1934_v29, %v1936_v33 }
  0xd3   : > { %2068 = vmatprep.subr.mxu1 %v1951_v34 }
  0xd4   : > { %2069 = vmatpush1.msra.mxu1 %v1950_v35 }
  0xd5   : > { %3935 = vrot.lane.b32.xlu1 %v9704_v7, %s9615_s22  ;;  %v1940_v37 = vpop.permute.xlu1 %1939  ;;  %v1930_v38 = vpop.permute.xlu0 %1929  ;;  %9396 = vmatmul.mubr.msk.f32.vlgmr.msra.gmra.mxu1 %vm356_vm1, %v9394_v36 }
  0xd6   : > { %3933 = vrot.lane.b32.xlu0 %v9707_v8, %s9615_s22  ;;  %v1948_v39 = vsel %vm1947_vm5, %v1930_v38, %v1932_v30  ;;  %2244 = vmatprep.mubr.f32.mxu1 %v9604_v0  ;;  %v1952_v43 = vsel %vm1947_vm5, %v1938_v32, %v1940_v37 }
  0xd7   : > { %1998 = vmatpush1.msra.mxu0 %v1948_v39 }
  0xd8   : > { %9395 = vmatmul.mubr.msk.f32.vlgmr.msra.gmra.mxu0 %vm356_vm1, %v9394_v36 }
  0xd9   : > { %4255 = vrot.lane.b32.xlu1 %v9683_v2, %s9616_s26  ;;  %v1944_v40 = vpop.permute.xlu1 %1943  ;;  %v1942_v41 = vpop.permute.xlu0 %1941  ;;  %2173 = vmatprep.mubr.f32.mxu0 %v9604_v0 }
  0xda   : > { %3937 = vrot.lane.b32.xlu0 %v9717_v9, %s9615_s22  ;;  %v1953_v42 = vsel %vm1947_vm5, %v1940_v37, %v1942_v41  ;;  %v1954_v47 = vsel %vm1947_vm5, %v1942_v41, %v1944_v40  ;;  %v9409_v37 = vld [vmem:[%s10965_s0 + $0x40] sm:$0xff]  ;;  %s9622_s22 = smov 56  }
  0xdb   : > { %2139 = vmatprep.subr.mxu0 %v1953_v42 }
  0xdc   : > { %2140 = vmatpush1.msra.mxu0 %v1952_v43 }
  0xdd   : > { %4259 = vrot.lane.b32.xlu1 %v9680_v1, %s9616_s26  ;;  %v2264_v44 = vpop.permute.xlu1 %2263  ;;  %v1946_v45 = vpop.permute.xlu0 %1945  ;;  %9397 = vmatmul.mubr.msk.f32.vlgmr.msra.gmra.mxu0 %vm356_vm1, %v9394_v36 }
  0xde   : > { %4257 = vrot.lane.b32.xlu0 %v9691_v4, %s9616_s26  ;;  %v1955_v46 = vsel %vm1947_vm5, %v1944_v40, %v1946_v45  ;;  %2363 = vmatprep.mubr.f32.mxu0 %v9604_v0  ;;  %vm7276_vm5 = vcmask 375808  }
  0xdf   : > { %2210 = vmatprep.subr.mxu1 %v1955_v46 }
  0xe0   : > { %2211 = vmatpush1.msra.mxu1 %v1954_v47 }
  0xe1   : > { %4253 = vrot.lane.b32.xlu1 %v9699_v6, %s9616_s26  ;;  %v2268_v48 = vpop.permute.xlu1 %2267  ;;  %v2266_v49 = vpop.permute.xlu0 %2265  ;;  %9398 = vmatmul.mubr.msk.f32.vlgmr.msra.gmra.mxu1 %vm356_vm1, %v9394_v36 }
  0xe2   : > { %4261 = vrot.lane.b32.xlu0 %v9688_v3, %s9616_s26  ;;  %v2281_v50 = vsel %vm2279_vm6, %v2264_v44, %v2266_v49  ;;  %2434 = vmatprep.mubr.f32.mxu1 %v9604_v0  ;;  %v2282_v56 = vsel %vm2279_vm6, %v2266_v49, %v2268_v48 }
  0xe3   : > { %2329 = vmatprep.subr.mxu0 %v2281_v50 }
  0xe5   : > { %4265 = vrot.lane.b32.xlu1 %v9707_v8, %s9616_s26  ;;  %v2262_v51 = vpop.permute.xlu1 %2261  ;;  %v2270_v52 = vpop.permute.xlu0 %2269 }
  0xe6   : > { %4263 = vrot.lane.b32.xlu0 %v9696_v5, %s9616_s26  ;;  %v2280_v54 = vsel %vm2279_vm6, %v2262_v51, %v2264_v44  ;;  %v2283_v55 = vsel %vm2279_vm6, %v2268_v48, %v2270_v52 }
  0xe7   : > { %2330 = vmatpush1.msra.mxu0 %v2280_v54  ;;  %2400 = vmatprep.subr.mxu1 %v2283_v55  ;;  %v9414_v55 = vld [vmem:[%s10965_s0 + $0x48] sm:$0xff] }
  0xe8   : > { %2401 = vmatpush1.msra.mxu1 %v2282_v56  ;;  %9400 = vmatmul.mubr.msk.f32.vlgmr.msra.gmra.mxu0 %vm356_vm1, %v9399_v53 }
  0xe9   : > { %4269 = vrot.lane.b32.xlu1 %v9717_v9, %s9616_s26  ;;  %v2274_v57 = vpop.permute.xlu1 %2273  ;;  %v2272_v58 = vpop.permute.xlu0 %2271  ;;  %9401 = vmatmul.mubr.msk.f32.vlgmr.msra.gmra.mxu1 %vm356_vm1, %v9399_v53 }
  0xea   : > { %4267 = vrot.lane.b32.xlu0 %v9704_v7, %s9616_s26  ;;  %v2285_v59 = vsel %vm2279_vm6, %v2272_v58, %v2274_v57  ;;  %v2284_v60 = vsel %vm2279_vm6, %v2270_v52, %v2272_v58  ;;  %2576 = vmatprep.mubr.f32.mxu1 %v9604_v0  ;;  %s9623_s26 = smov 55  }
  0xeb   : > { %2471 = vmatprep.subr.mxu0 %v2285_v59  ;;  %2505 = vmatprep.mubr.f32.mxu0 %v9604_v0 }
  0xec   : > { %2472 = vmatpush1.msra.mxu0 %v2284_v60 }
  0xed   : > { %4589 = vrot.lane.b32.xlu1 %v9691_v4, %s9617_s29  ;;  %v2278_v61 = vpop.permute.xlu1 %2277  ;;  %v2276_v62 = vpop.permute.xlu0 %2275  ;;  %9402 = vmatmul.mubr.msk.f32.vlgmr.msra.gmra.mxu0 %vm356_vm1, %v9399_v53 }
  0xee   : > { %4587 = vrot.lane.b32.xlu0 %v9683_v2, %s9617_s29  ;;  %v2287_v63 = vsel %vm2279_vm6, %v2276_v62, %v2278_v61  ;;  %v2286_v10 = vsel %vm2279_vm6, %v2274_v57, %v2276_v62  ;;  %2695 = vmatprep.mubr.f32.mxu0 %v9604_v0  ;;  %vm7608_vm6 = vcmask 367616  }
  0xef   : > { %2542 = vmatprep.subr.mxu1 %v2287_v63 }
  0xf0   : > { %2543 = vmatpush1.msra.mxu1 %v2286_v10 }
  0xf1   : > { %4593 = vrot.lane.b32.xlu1 %v9688_v3, %s9617_s29  ;;  %v2598_v11 = vpop.permute.xlu1 %2597  ;;  %v2596_v12 = vpop.permute.xlu0 %2595  ;;  %9403 = vmatmul.mubr.msk.f32.vlgmr.msra.gmra.mxu1 %vm356_vm1, %v9399_v53 }
  0xf2   : > { %4591 = vrot.lane.b32.xlu0 %v9680_v1, %s9617_s29  ;;  %v2613_v13 = vsel %vm2611_vm7, %v2596_v12, %v2598_v11  ;;  %2766 = vmatprep.mubr.f32.mxu1 %v9604_v0 }
  0xf3   : > { %2661 = vmatprep.subr.mxu0 %v2613_v13  ;;  %v9419_v13 = vld [vmem:[%s10965_s0 + $0x50] sm:$0xff] }
  0xf5   : > { %4595 = vrot.lane.b32.xlu1 %v9696_v5, %s9617_s29  ;;  %v2602_v14 = vpop.permute.xlu1 %2601  ;;  %v2600_v15 = vpop.permute.xlu0 %2599 }
  0xf6   : > { %4585 = vrot.lane.b32.xlu0 %v9699_v6, %s9617_s29  ;;  %v2615_v16 = vsel %vm2611_vm7, %v2600_v15, %v2602_v14  ;;  %v2614_v17 = vsel %vm2611_vm7, %v2598_v11, %v2600_v15 }
  0xf7   : > { %2732 = vmatprep.subr.mxu1 %v2615_v16 }
  0xf8   : > { %2733 = vmatpush1.msra.mxu1 %v2614_v17  ;;  %v10154_v17 = vld [vmem:[%s9675_s19 + $0x8] sm:$0xff] }
  0xf9   : > { %4599 = vrot.lane.b32.xlu1 %v9704_v7, %s9617_s29  ;;  %v2604_v19 = vpop.permute.xlu1 %2603  ;;  %v2594_v20 = vpop.permute.xlu0 %2593  ;;  %9406 = vmatmul.mubr.msk.f32.vlgmr.msra.gmra.mxu1 %vm356_vm1, %v9404_v18 }
  0xfa   : > { %4597 = vrot.lane.b32.xlu0 %v9707_v8, %s9617_s29  ;;  %v2612_v21 = vsel %vm2611_vm7, %v2594_v20, %v2596_v12  ;;  %2908 = vmatprep.mubr.f32.mxu1 %v9604_v0  ;;  %v2616_v25 = vsel %vm2611_vm7, %v2602_v14, %v2604_v19  ;;  %v10160_v20 = vld [vmem:[%s9675_s19 + $0x20] sm:$0xff] }
  0xfb   : > { %2662 = vmatpush1.msra.mxu0 %v2612_v21 }
  0xfc   : > { %9405 = vmatmul.mubr.msk.f32.vlgmr.msra.gmra.mxu0 %vm356_vm1, %v9404_v18 }
  0xfd   : > { %4919 = vrot.lane.b32.xlu1 %v9683_v2, %s9618_s5  ;;  %2837 = vmatprep.mubr.f32.mxu0 %v9604_v0 }
  0xfe   : > { %4601 = vrot.lane.b32.xlu0 %v9717_v9, %s9617_s29  ;;  %v2608_v22 = vpop.permute.xlu1 %2607  ;;  %v2606_v23 = vpop.permute.xlu0 %2605  ;;  %s9624_s29 = smov 54  }
  0xff   : > { %v2617_v24 = vsel %vm2611_vm7, %v2604_v19, %v2606_v23  ;;  %v2618_v29 = vsel %vm2611_vm7, %v2606_v23, %v2608_v22  ;;  %v10168_v23 = vld [vmem:[%s9675_s19 + $0x18] sm:$0xff] }
 0x100   : > { %2803 = vmatprep.subr.mxu0 %v2617_v24 }
 0x101   : > { %4923 = vrot.lane.b32.xlu1 %v9680_v1, %s9618_s5  ;;  %2804 = vmatpush1.msra.mxu0 %v2616_v25 }
 0x102   : > { %4921 = vrot.lane.b32.xlu0 %v9691_v4, %s9618_s5  ;;  %v2928_v26 = vpop.permute.xlu1 %2927  ;;  %v2610_v27 = vpop.permute.xlu0 %2609  ;;  %9407 = vmatmul.mubr.msk.f32.vlgmr.msra.gmra.mxu0 %vm356_vm1, %v9404_v18 }
 0x103   : > { %v2619_v28 = vsel %vm2611_vm7, %v2608_v22, %v2610_v27  ;;  %3027 = vmatprep.mubr.f32.mxu0 %v9604_v0  ;;  %vm7940_vm7 = vcmask 359424  }
 0x104   : > { %2874 = vmatprep.subr.mxu1 %v2619_v28  ;;  %v9568_v28 = vld [vmem:[%s9675_s19] sm:$0xff] }
 0x105   : > { %4917 = vrot.lane.b32.xlu1 %v9699_v6, %s9618_s5  ;;  %2875 = vmatpush1.msra.mxu1 %v2618_v29 }
 0x106   : > { %4925 = vrot.lane.b32.xlu0 %v9688_v3, %s9618_s5  ;;  %v2932_v30 = vpop.permute.xlu1 %2931  ;;  %v2930_v31 = vpop.permute.xlu0 %2929  ;;  %9408 = vmatmul.mubr.msk.f32.vlgmr.msra.gmra.mxu1 %vm356_vm1, %v9404_v18 }
 0x107   : > { %v2945_v32 = vsel %vm2943_vm8, %v2928_v26, %v2930_v31  ;;  %3098 = vmatprep.mubr.f32.mxu1 %v9604_v0  ;;  %v2946_v38 = vsel %vm2943_vm8, %v2930_v31, %v2932_v30  ;;  %v10183_v31 = vld [vmem:[%s9675_s19 + $0x38] sm:$0xff] }
 0x108   : > { %2993 = vmatprep.subr.mxu0 %v2945_v32 }
 0x109   : > { %4929 = vrot.lane.b32.xlu1 %v9707_v8, %s9618_s5 }
 0x10a   : > { %4927 = vrot.lane.b32.xlu0 %v9696_v5, %s9618_s5  ;;  %v2926_v33 = vpop.permute.xlu1 %2925  ;;  %v2934_v34 = vpop.permute.xlu0 %2933 }
 0x10b   : > { %v2944_v35 = vsel %vm2943_vm8, %v2926_v33, %v2928_v26  ;;  %v2947_v36 = vsel %vm2943_vm8, %v2932_v30, %v2934_v34  ;;  %v10174_v26 = vld [vmem:[%s9675_s19 + $0x28] sm:$0xff] }
 0x10c   : > { %2994 = vmatpush1.msra.mxu0 %v2944_v35  ;;  %3064 = vmatprep.subr.mxu1 %v2947_v36  ;;  %v9424_v36 = vld [vmem:[%s10965_s0 + $0x58] sm:$0xff] }
 0x10d   : > { %4933 = vrot.lane.b32.xlu1 %v9717_v9, %s9618_s5  ;;  %3065 = vmatpush1.msra.mxu1 %v2946_v38 }
 0x10e   : > { %4931 = vrot.lane.b32.xlu0 %v9704_v7, %s9618_s5  ;;  %v2938_v39 = vpop.permute.xlu1 %2937  ;;  %9410 = vmatmul.mubr.msk.f32.vlgmr.msra.gmra.mxu0 %vm356_vm1, %v9409_v37  ;;  %s9625_s5 = smov 46  }
 0x10f   : > { %v2936_v40 = vpop.permute.xlu0 %2935  ;;  %9411 = vmatmul.mubr.msk.f32.vlgmr.msra.gmra.mxu1 %vm356_vm1, %v9409_v37  ;;  %3169 = vmatprep.mubr.f32.mxu0 %v9604_v0 }
 0x110   : > { %v2949_v41 = vsel %vm2943_vm8, %v2936_v40, %v2938_v39  ;;  %v2948_v42 = vsel %vm2943_vm8, %v2934_v34, %v2936_v40  ;;  %3240 = vmatprep.mubr.f32.mxu1 %v9604_v0  ;;  %v10190_v34 = vld [vmem:[%s9675_s19 + $0x30] sm:$0xff] }
 0x111   : > { %5253 = vrot.lane.b32.xlu1 %v9691_v4, %s9619_s8  ;;  %3135 = vmatprep.subr.mxu0 %v2949_v41 }
 0x112   : > { %5251 = vrot.lane.b32.xlu0 %v9683_v2, %s9619_s8  ;;  %3136 = vmatpush1.msra.mxu0 %v2948_v42 }
 0x113   : > { %v2942_v43 = vpop.permute.xlu1 %2941  ;;  %v2940_v44 = vpop.permute.xlu0 %2939  ;;  %9412 = vmatmul.mubr.msk.f32.vlgmr.msra.gmra.mxu0 %vm356_vm1, %v9409_v37 }
 0x114   : > { %v2951_v45 = vsel %vm2943_vm8, %v2940_v44, %v2942_v43  ;;  %v2950_v46 = vsel %vm2943_vm8, %v2938_v39, %v2940_v44  ;;  %3359 = vmatprep.mubr.f32.mxu0 %v9604_v0  ;;  %v10203_v39 = vld [vmem:[%s9712_s24] sm:$0xff]  ;;  %vm8272_vm8 = vcmask 293888  }
 0x115   : > { %5257 = vrot.lane.b32.xlu1 %v9688_v3, %s9619_s8  ;;  %3206 = vmatprep.subr.mxu1 %v2951_v45 }
 0x116   : > { %5255 = vrot.lane.b32.xlu0 %v9680_v1, %s9619_s8  ;;  %3207 = vmatpush1.msra.mxu1 %v2950_v46 }
 0x117   : > { %v3262_v47 = vpop.permute.xlu1 %3261  ;;  %9413 = vmatmul.mubr.msk.f32.vlgmr.msra.gmra.mxu1 %vm356_vm1, %v9409_v37 }
 0x118   : > { %v3260_v48 = vpop.permute.xlu0 %3259  ;;  %3430 = vmatprep.mubr.f32.mxu1 %v9604_v0 }
 0x119   : > { %5259 = vrot.lane.b32.xlu1 %v9696_v5, %s9619_s8  ;;  %v3277_v49 = vsel %vm3275_vm9, %v3260_v48, %v3262_v47 }
 0x11a   : > { %5249 = vrot.lane.b32.xlu0 %v9699_v6, %s9619_s8  ;;  %3325 = vmatprep.subr.mxu0 %v3277_v49 }
 0x11b   : > { %v3266_v50 = vpop.permute.xlu1 %3265 }
 0x11c   : > { %v3264_v51 = vpop.permute.xlu0 %3263 }
 0x11d   : > { %5263 = vrot.lane.b32.xlu1 %v9704_v7, %s9619_s8  ;;  %v3279_v52 = vsel %vm3275_vm9, %v3264_v51, %v3266_v50  ;;  %v3278_v53 = vsel %vm3275_vm9, %v3262_v47, %v3264_v51  ;;  %v10231_v51 = vld [vmem:[%s9712_s24 + $0x8] sm:$0xff] }
 0x11e   : > { %5261 = vrot.lane.b32.xlu0 %v9707_v8, %s9619_s8  ;;  %3396 = vmatprep.subr.mxu1 %v3279_v52 }
 0x11f   : > { %3397 = vmatpush1.msra.mxu1 %v3278_v53  ;;  %v3268_v54 = vpop.permute.xlu1 %3267 }
 0x120   : > { %v3258_v56 = vpop.permute.xlu0 %3257  ;;  %9416 = vmatmul.mubr.msk.f32.vlgmr.msra.gmra.mxu1 %vm356_vm1, %v9414_v55 }
 0x121   : > { %v3276_v57 = vsel %vm3275_vm9, %v3258_v56, %v3260_v48  ;;  %5582 = vrot.lane.b32.xlu1 %v9683_v2, %s9620_s11  ;;  %3572 = vmatprep.mubr.f32.mxu1 %v9604_v0  ;;  %v3280_v2 = vsel %vm3275_vm9, %v3266_v50, %v3268_v54 }
 0x122   : > { %5265 = vrot.lane.b32.xlu0 %v9717_v9, %s9619_s8  ;;  %3326 = vmatpush1.msra.mxu0 %v3276_v57  ;;  %s9626_s8 = smov 45  }
 0x123   : > { %v3272_v58 = vpop.permute.xlu1 %3271  ;;  %9415 = vmatmul.mubr.msk.f32.vlgmr.msra.gmra.mxu0 %vm356_vm1, %v9414_v55 }
 0x124   : > { %v3270_v59 = vpop.permute.xlu0 %3269  ;;  %3501 = vmatprep.mubr.f32.mxu0 %v9604_v0 }
 0x125   : > { %5586 = vrot.lane.b32.xlu1 %v9680_v1, %s9620_s11  ;;  %v3281_v60 = vsel %vm3275_vm9, %v3268_v54, %v3270_v59  ;;  %v3282_v1 = vsel %vm3275_vm9, %v3270_v59, %v3272_v58 }
 0x126   : > { %5584 = vrot.lane.b32.xlu0 %v9691_v4, %s9620_s11  ;;  %3467 = vmatprep.subr.mxu0 %v3281_v60 }
 0x127   : > { %3468 = vmatpush1.msra.mxu0 %v3280_v2  ;;  %v3592_v61 = vpop.permute.xlu1 %3591 }
 0x128   : > { %v3274_v62 = vpop.permute.xlu0 %3273  ;;  %9417 = vmatmul.mubr.msk.f32.vlgmr.msra.gmra.mxu0 %vm356_vm1, %v9414_v55 }
 0x129   : > { %5580 = vrot.lane.b32.xlu1 %v9699_v6, %s9620_s11  ;;  %v3283_v63 = vsel %vm3275_vm9, %v3272_v58, %v3274_v62  ;;  %3691 = vmatprep.mubr.f32.mxu0 %v9604_v0  ;;  %vm8604_vm9 = vcmask 285696  }
 0x12a   : > { %5588 = vrot.lane.b32.xlu0 %v9688_v3, %s9620_s11  ;;  %3538 = vmatprep.subr.mxu1 %v3283_v63 }
 0x12b   : > { %3539 = vmatpush1.msra.mxu1 %v3282_v1  ;;  %v3596_v4 = vpop.permute.xlu1 %3595 }
 0x12c   : > { %v3594_v10 = vpop.permute.xlu0 %3593  ;;  %9418 = vmatmul.mubr.msk.f32.vlgmr.msra.gmra.mxu1 %vm356_vm1, %v9414_v55  ;;  %v9429_v55 = vld [vmem:[%s10965_s0 + $0x60] sm:$0xff] }
 0x12d   : > { %5592 = vrot.lane.b32.xlu1 %v9707_v8, %s9620_s11  ;;  %v3609_v6 = vsel %vm3607_vm10, %v3592_v61, %v3594_v10  ;;  %3762 = vmatprep.mubr.f32.mxu1 %v9604_v0 }
 0x12e   : > { %5590 = vrot.lane.b32.xlu0 %v9696_v5, %s9620_s11  ;;  %3657 = vmatprep.subr.mxu0 %v3609_v6  ;;  %v3610_v5 = vsel %vm3607_vm10, %v3594_v10, %v3596_v4 }
 0x12f   : > { %v3590_v3 = vpop.permute.xlu1 %3589 }
 0x130   : > { %v3608_v11 = vsel %vm3607_vm10, %v3590_v3, %v3592_v61  ;;  %v3598_v12 = vpop.permute.xlu0 %3597 }
 0x131   : > { %5596 = vrot.lane.b32.xlu1 %v9717_v9, %s9620_s11  ;;  %3658 = vmatpush1.msra.mxu0 %v3608_v11  ;;  %v3611_v8 = vsel %vm3607_vm10, %v3596_v4, %v3598_v12  ;;  %v10146_v9 = vld [vmem:[%s9675_s19 + $0x10] sm:$0xff] }
 0x132   : > { %5594 = vrot.lane.b32.xlu0 %v9704_v7, %s9620_s11  ;;  %3728 = vmatprep.subr.mxu1 %v3611_v8  ;;  %s9627_s11 = smov 44  }
 0x133   : > { %3729 = vmatpush1.msra.mxu1 %v3610_v5  ;;  %v3602_v14 = vpop.permute.xlu1 %3601  ;;  %9420 = vmatmul.mubr.msk.f32.vlgmr.msra.gmra.mxu0 %vm356_vm1, %v9419_v13 }
 0x134   : > { %v3600_v15 = vpop.permute.xlu0 %3599  ;;  %9421 = vmatmul.mubr.msk.f32.vlgmr.msra.gmra.mxu1 %vm356_vm1, %v9419_v13  ;;  %3833 = vmatprep.mubr.f32.mxu0 %v9604_v0 }
 0x135   : > { %5916 = vrot.lane.b32.xlu1 %v10146_v9, %s9621_s18  ;;  %v3613_v7 = vsel %vm3607_vm10, %v3600_v15, %v3602_v14  ;;  %v3612_v16 = vsel %vm3607_vm10, %v3598_v12, %v3600_v15  ;;  %3904 = vmatprep.mubr.f32.mxu1 %v9604_v0  ;;  %v9434_v15 = vld [vmem:[%s10965_s0 + $0x68] sm:$0xff] }
 0x136   : > { %5914 = vrot.lane.b32.xlu0 %v10154_v17, %s9621_s18  ;;  %3799 = vmatprep.subr.mxu0 %v3613_v7 }
 0x137   : > { %3800 = vmatpush1.msra.mxu0 %v3612_v16  ;;  %v3606_v18 = vpop.permute.xlu1 %3605 }
 0x138   : > { %v3604_v19 = vpop.permute.xlu0 %3603  ;;  %9422 = vmatmul.mubr.msk.f32.vlgmr.msra.gmra.mxu0 %vm356_vm1, %v9419_v13 }
 0x139   : > { %5920 = vrot.lane.b32.xlu1 %v10160_v20, %s9621_s18  ;;  %v3615_v21 = vsel %vm3607_vm10, %v3604_v19, %v3606_v18  ;;  %v3614_v22 = vsel %vm3607_vm10, %v3602_v14, %v3604_v19  ;;  %4023 = vmatprep.mubr.f32.mxu0 %v9604_v0  ;;  %vm8936_vm10 = vcmask 277504  }
 0x13a   : > { %5918 = vrot.lane.b32.xlu0 %v10168_v23, %s9621_s18  ;;  %3870 = vmatprep.subr.mxu1 %v3615_v21 }
 0x13b   : > { %3871 = vmatpush1.msra.mxu1 %v3614_v22  ;;  %v3926_v24 = vpop.permute.xlu1 %3925 }
 0x13c   : > { %v3924_v25 = vpop.permute.xlu0 %3923  ;;  %9423 = vmatmul.mubr.msk.f32.vlgmr.msra.gmra.mxu1 %vm356_vm1, %v9419_v13 }
 0x13d   : > { %5922 = vrot.lane.b32.xlu1 %v10174_v26, %s9621_s18  ;;  %v3941_v27 = vsel %vm3939_vm11, %v3924_v25, %v3926_v24  ;;  %4094 = vmatprep.mubr.f32.mxu1 %v9604_v0 }
 0x13e   : > { %5912 = vrot.lane.b32.xlu0 %v9568_v28, %s9621_s18  ;;  %3989 = vmatprep.subr.mxu0 %v3941_v27 }
 0x13f   : > { %v3930_v29 = vpop.permute.xlu1 %3929 }
 0x140   : > { %v3928_v30 = vpop.permute.xlu0 %3927 }
 0x141   : > { %5926 = vrot.lane.b32.xlu1 %v10183_v31, %s9621_s18  ;;  %v3943_v32 = vsel %vm3939_vm11, %v3928_v30, %v3930_v29  ;;  %v3942_v33 = vsel %vm3939_vm11, %v3926_v24, %v3928_v30 }
 0x142   : > { %5924 = vrot.lane.b32.xlu0 %v10190_v34, %s9621_s18  ;;  %4060 = vmatprep.subr.mxu1 %v3943_v32 }
 0x143   : > { %4061 = vmatpush1.msra.mxu1 %v3942_v33  ;;  %v3932_v35 = vpop.permute.xlu1 %3931 }
 0x144   : > { %v3922_v37 = vpop.permute.xlu0 %3921  ;;  %9426 = vmatmul.mubr.msk.f32.vlgmr.msra.gmra.mxu1 %vm356_vm1, %v9424_v36  ;;  %v3944_v43 = vsel %vm3939_vm11, %v3930_v29, %v3932_v35 }
 0x145   : > { %v3940_v38 = vsel %vm3939_vm11, %v3922_v37, %v3924_v25  ;;  %6264 = vrot.lane.b32.xlu1 %v10146_v9, %s9622_s22  ;;  %4236 = vmatprep.mubr.f32.mxu1 %v9604_v0 }
 0x146   : > { %5928 = vrot.lane.b32.xlu0 %v10203_v39, %s9621_s18  ;;  %3990 = vmatpush1.msra.mxu0 %v3940_v38  ;;  %s9628_s18 = smov 36  }
 0x147   : > { %v3936_v40 = vpop.permute.xlu1 %3935  ;;  %9425 = vmatmul.mubr.msk.f32.vlgmr.msra.gmra.mxu0 %vm356_vm1, %v9424_v36 }
 0x148   : > { %v3934_v41 = vpop.permute.xlu0 %3933  ;;  %4165 = vmatprep.mubr.f32.mxu0 %v9604_v0 }
 0x149   : > { %6268 = vrot.lane.b32.xlu1 %v10160_v20, %s9622_s22  ;;  %v3945_v42 = vsel %vm3939_vm11, %v3932_v35, %v3934_v41  ;;  %v3946_v47 = vsel %vm3939_vm11, %v3934_v41, %v3936_v40 }
 0x14a   : > { %6266 = vrot.lane.b32.xlu0 %v10168_v23, %s9622_s22  ;;  %4131 = vmatprep.subr.mxu0 %v3945_v42 }
 0x14b   : > { %4132 = vmatpush1.msra.mxu0 %v3944_v43  ;;  %v4256_v44 = vpop.permute.xlu1 %4255 }
 0x14c   : > { %v3938_v45 = vpop.permute.xlu0 %3937  ;;  %9427 = vmatmul.mubr.msk.f32.vlgmr.msra.gmra.mxu0 %vm356_vm1, %v9424_v36 }
 0x14d   : > { %6262 = vrot.lane.b32.xlu1 %v10154_v17, %s9622_s22  ;;  %v3947_v46 = vsel %vm3939_vm11, %v3936_v40, %v3938_v45  ;;  %4355 = vmatprep.mubr.f32.mxu0 %v9604_v0 }
 0x14e   : > { %6270 = vrot.lane.b32.xlu0 %v10174_v26, %s9622_s22  ;;  %4202 = vmatprep.subr.mxu1 %v3947_v46  ;;  %v497_v5 = vpop.f32.mrf.mxu1 }
 0x14f   : > { %4203 = vmatpush1.msra.mxu1 %v3946_v47  ;;  %v4260_v48 = vpop.permute.xlu1 %4259 }
 0x150   : > { %v4258_v49 = vpop.permute.xlu0 %4257  ;;  %9428 = vmatmul.mubr.msk.f32.vlgmr.msra.gmra.mxu1 %vm356_vm1, %v9424_v36  ;;  %v499_v18 = vpop.f32.mrf.mxu1 }
 0x151   : > { %6274 = vrot.lane.b32.xlu1 %v10183_v31, %s9622_s22  ;;  %v4273_v50 = vsel %vm4271_vm12, %v4256_v44, %v4258_v49  ;;  %4426 = vmatprep.mubr.f32.mxu1 %v9604_v0  ;;  %v4274_v57 = vsel %vm4271_vm12, %v4258_v49, %v4260_v48  ;;  %v426_v8 = vpop.f32.mrf.mxu0 }
 0x152   : > { %6272 = vrot.lane.b32.xlu0 %v10190_v34, %s9622_s22  ;;  %4321 = vmatprep.subr.mxu0 %v4273_v50 }
 0x153   : > { %v4254_v52 = vpop.permute.xlu1 %4253  ;;  %v428_v7 = vpop.f32.mrf.mxu0 }
 0x154   : > { %v4272_v53 = vsel %vm4271_vm12, %v4254_v52, %v4256_v44  ;;  %v4262_v54 = vpop.permute.xlu0 %4261 }
 0x155   : > { %6278 = vrot.lane.b32.xlu1 %v10231_v51, %s9622_s22  ;;  %4322 = vmatpush1.msra.mxu0 %v4272_v53  ;;  %v4275_v56 = vsel %vm4271_vm12, %v4260_v48, %v4262_v54 }
 0x156   : > { %6276 = vrot.lane.b32.xlu0 %v10203_v39, %s9622_s22  ;;  %4392 = vmatprep.subr.mxu1 %v4275_v56  ;;  %v568_v21 = vpop.f32.mrf.mxu0  ;;  %s9629_s22 = smov 35  }
 0x157   : > { %4393 = vmatpush1.msra.mxu1 %v4274_v57  ;;  %v4266_v58 = vpop.permute.xlu1 %4265  ;;  %9430 = vmatmul.mubr.msk.f32.vlgmr.msra.gmra.mxu0 %vm356_vm1, %v9429_v55 }
 0x158   : > { %v4264_v59 = vpop.permute.xlu0 %4263  ;;  %9431 = vmatmul.mubr.msk.f32.vlgmr.msra.gmra.mxu1 %vm356_vm1, %v9429_v55  ;;  %4497 = vmatprep.mubr.f32.mxu0 %v9604_v0  ;;  %v570_v25 = vpop.f32.mrf.mxu0 }
 0x159   : > { %6598 = vrot.lane.b32.xlu1 %v10168_v23, %s9623_s26  ;;  %v4277_v60 = vsel %vm4271_vm12, %v4264_v59, %v4266_v58  ;;  %v4276_v2 = vsel %vm4271_vm12, %v4262_v54, %v4264_v59  ;;  %4568 = vmatprep.mubr.f32.mxu1 %v9604_v0 }
 0x15a   : > { %6596 = vrot.lane.b32.xlu0 %v10146_v9, %s9623_s26  ;;  %4463 = vmatprep.subr.mxu0 %v4277_v60  ;;  %v639_v22 = vpop.f32.mrf.mxu1 }
 0x15b   : > { %4464 = vmatpush1.msra.mxu0 %v4276_v2  ;;  %v4270_v61 = vpop.permute.xlu1 %4269  ;;  %v713_v30 = vpop.f32.mrf.mxu0 }
 0x15c   : > { %v4268_v62 = vpop.permute.xlu0 %4267  ;;  %9432 = vmatmul.mubr.msk.f32.vlgmr.msra.gmra.mxu0 %vm356_vm1, %v9429_v55  ;;  %v641_v28 = vpop.f32.mrf.mxu1  ;;  %v714_v33 = vadd.f32 %v713_v30, %v426_v8 }
 0x15d   : > { %6602 = vrot.lane.b32.xlu1 %v10174_v26, %s9623_s26  ;;  %v4279_v63 = vsel %vm4271_vm12, %v4268_v62, %v4270_v61  ;;  %v4278_v1 = vsel %vm4271_vm12, %v4266_v58, %v4268_v62  ;;  %4687 = vmatprep.mubr.f32.mxu0 %v9604_v0  ;;  %v715_v38 = vpop.f32.mrf.mxu0 }
 0x15e   : > { %6600 = vrot.lane.b32.xlu0 %v10160_v20, %s9623_s26  ;;  %4534 = vmatprep.subr.mxu1 %v4279_v63  ;;  %v716_v41 = vadd.f32 %v715_v38, %v428_v7 }
 0x15f   : > { %4535 = vmatpush1.msra.mxu1 %v4278_v1  ;;  %v4590_v4 = vpop.permute.xlu1 %4589  ;;  %v784_v35 = vpop.f32.mrf.mxu1 }
 0x160   : > { %v4588_v10 = vpop.permute.xlu0 %4587  ;;  %9433 = vmatmul.mubr.msk.f32.vlgmr.msra.gmra.mxu1 %vm356_vm1, %v9429_v55  ;;  %v785_v37 = vadd.f32 %v784_v35, %v497_v5 }
 0x161   : > { %6604 = vrot.lane.b32.xlu1 %v10190_v34, %s9623_s26  ;;  %v4605_v6 = vsel %vm4603_vm13, %v4588_v10, %v4590_v4  ;;  %4758 = vmatprep.mubr.f32.mxu1 %v9604_v0  ;;  %v786_v42 = vpop.f32.mrf.mxu1 }
 0x162   : > { %6594 = vrot.lane.b32.xlu0 %v10154_v17, %s9623_s26  ;;  %4653 = vmatprep.subr.mxu0 %v4605_v6  ;;  %v787_v44 = vadd.f32 %v786_v42, %v499_v18  ;;  %v855_v45 = vpop.f32.mrf.mxu0 }
 0x163   : > { %v4594_v3 = vpop.permute.xlu1 %4593  ;;  %v856_v47 = vadd.f32 %v855_v45, %v568_v21 }
 0x164   : > { %v4592_v11 = vpop.permute.xlu0 %4591  ;;  %v926_v48 = vpop.f32.mrf.mxu1 }
 0x165   : > { %6608 = vrot.lane.b32.xlu1 %v10203_v39, %s9623_s26  ;;  %v4607_v12 = vsel %vm4603_vm13, %v4592_v11, %v4594_v3  ;;  %v4606_v13 = vsel %vm4603_vm13, %v4590_v4, %v4592_v11  ;;  %v927_v50 = vadd.f32 %v926_v48, %v639_v22  ;;  %v857_v52 = vpop.f32.mrf.mxu0  ;;  %v9439_v4 = vld [vmem:[%s10965_s0 + $0x70] sm:$0xff] }
 0x166   : > { %6606 = vrot.lane.b32.xlu0 %v10183_v31, %s9623_s26  ;;  %4724 = vmatprep.subr.mxu1 %v4607_v12  ;;  %v928_v54 = vpop.f32.mrf.mxu1  ;;  %v858_v56 = vadd.f32 %v857_v52, %v570_v25 }
 0x167   : > { %4725 = vmatpush1.msra.mxu1 %v4606_v13  ;;  %v4596_v14 = vpop.permute.xlu1 %4595  ;;  %v1037_v57 = vpop.f32.mrf.mxu0  ;;  %v929_v58 = vadd.f32 %v928_v54, %v641_v28 }
 0x168   : > { %v4586_v16 = vpop.permute.xlu0 %4585  ;;  %9436 = vmatmul.mubr.msk.f32.vlgmr.msra.gmra.mxu1 %vm356_vm1, %v9434_v15  ;;  %v4608_v32 = vsel %vm4603_vm13, %v4594_v3, %v4596_v14  ;;  %v1255_v59 = vadd.f32 %v1037_v57, %v714_v33 }
 0x169   : > { %v4604_v19 = vsel %vm4603_vm13, %v4586_v16, %v4588_v10  ;;  %6928 = vrot.lane.b32.xlu1 %v10146_v9, %s9624_s29  ;;  %4900 = vmatprep.mubr.f32.mxu1 %v9604_v0  ;;  %v1108_v60 = vpop.f32.mrf.mxu1  ;;  %v1039_v62 = vpop.f32.mrf.mxu0 }
 0x16a   : > { %6610 = vrot.lane.b32.xlu0 %v10231_v51, %s9623_s26  ;;  %4654 = vmatpush1.msra.mxu0 %v4604_v19  ;;  %v1257_v61 = vadd.f32 %v1108_v60, %v785_v37  ;;  %v1256_v3 = vadd.f32 %v1039_v62, %v716_v41  ;;  %s9630_s26 = smov 34  }
 0x16b   : > { %v4600_v24 = vpop.permute.xlu1 %4599  ;;  %9435 = vmatmul.mubr.msk.f32.vlgmr.msra.gmra.mxu0 %vm356_vm1, %v9434_v15  ;;  %v1110_v10 = vpop.f32.mrf.mxu1 }
 0x16c   : > { %v4598_v27 = vpop.permute.xlu0 %4597  ;;  %4829 = vmatprep.mubr.f32.mxu0 %v9604_v0  ;;  %v1258_v11 = vadd.f32 %v1110_v10, %v787_v44 }
 0x16d   : > { %6932 = vrot.lane.b32.xlu1 %v10160_v20, %s9624_s29  ;;  %v4609_v29 = vsel %vm4603_vm13, %v4596_v14, %v4598_v27  ;;  %v4610_v46 = vsel %vm4603_vm13, %v4598_v27, %v4600_v24  ;;  %v1250_v5 = vpop.f32.mrf.mxu1 }
 0x16e   : > { %6930 = vrot.lane.b32.xlu0 %v10168_v23, %s9624_s29  ;;  %4795 = vmatprep.subr.mxu0 %v4609_v29  ;;  %v1179_v12 = vpop.f32.mrf.mxu0 }
 0x16f   : > { %4796 = vmatpush1.msra.mxu0 %v4608_v32  ;;  %v4920_v36 = vpop.permute.xlu1 %4919  ;;  %v1259_v8 = vadd.f32 %v1179_v12, %v856_v47  ;;  %v1252_v18 = vpop.f32.mrf.mxu1 }
 0x170   : > { %v4602_v40 = vpop.permute.xlu0 %4601  ;;  %9437 = vmatmul.mubr.msk.f32.vlgmr.msra.gmra.mxu0 %vm356_vm1, %v9434_v15  ;;  %v1181_v7 = vpop.f32.mrf.mxu0  ;;  %v1262_v25 = vadd.f32 %v1252_v18, %v929_v58 }
 0x171   : > { %6926 = vrot.lane.b32.xlu1 %v10154_v17, %s9624_s29  ;;  %v4611_v43 = vsel %vm4603_vm13, %v4600_v24, %v4602_v40  ;;  %5019 = vmatprep.mubr.f32.mxu0 %v9604_v0  ;;  %v1260_v22 = vadd.f32 %v1181_v7, %v858_v56  ;;  %v1440_v28 = vpop.f32.mrf.mxu1 }
 0x172   : > { %6934 = vrot.lane.b32.xlu0 %v10174_v26, %s9624_s29  ;;  %4866 = vmatprep.subr.mxu1 %v4611_v43  ;;  %v1589_v30 = vadd.f32 %v1440_v28, %v1257_v61 }
 0x173   : > { %4867 = vmatpush1.msra.mxu1 %v4610_v46  ;;  %v4924_v49 = vpop.permute.xlu1 %4923 }
 0x174   : > { %v4922_v53 = vpop.permute.xlu0 %4921  ;;  %9438 = vmatmul.mubr.msk.f32.vlgmr.msra.gmra.mxu1 %vm356_vm1, %v9434_v15  ;;  %v1261_v15 = vadd.f32 %v1250_v5, %v927_v50  ;;  %v1369_v24 = vpop.f32.mrf.mxu0 }
 0x175   : > { %6938 = vrot.lane.b32.xlu1 %v10183_v31, %s9624_s29  ;;  %v4937_v55 = vsel %vm4935_vm14, %v4920_v36, %v4922_v53  ;;  %5090 = vmatprep.mubr.f32.mxu1 %v9604_v0  ;;  %v4938_v13 = vsel %vm4935_vm14, %v4922_v53, %v4924_v49  ;;  %v1587_v27 = vadd.f32 %v1369_v24, %v1255_v59 }
 0x176   : > { %6936 = vrot.lane.b32.xlu0 %v10190_v34, %s9624_s29  ;;  %4985 = vmatprep.subr.mxu0 %v4937_v55  ;;  %v1371_v32 = vpop.f32.mrf.mxu0 }
 0x177   : > { %v4918_v2 = vpop.permute.xlu1 %4917  ;;  %v1588_v35 = vadd.f32 %v1371_v32, %v1256_v3 }
 0x178   : > { %v4936_v63 = vsel %vm4935_vm14, %v4918_v2, %v4920_v36  ;;  %v4926_v1 = vpop.permute.xlu0 %4925  ;;  %v1442_v36 = vpop.f32.mrf.mxu1 }
 0x179   : > { %6942 = vrot.lane.b32.xlu1 %v10231_v51, %s9624_s29  ;;  %4986 = vmatpush1.msra.mxu0 %v4936_v63  ;;  %v4939_v6 = vsel %vm4935_vm14, %v4924_v49, %v4926_v1  ;;  %v1590_v40 = vadd.f32 %v1442_v36, %v1258_v11  ;;  %v1511_v41 = vpop.f32.mrf.mxu0 }
 0x17a   : > { %6940 = vrot.lane.b32.xlu0 %v10203_v39, %s9624_s29  ;;  %5056 = vmatprep.subr.mxu1 %v4939_v6  ;;  %v1591_v42 = vadd.f32 %v1511_v41, %v1259_v8  ;;  %v9444_v6 = vld [vmem:[%s10965_s0 + $0x78] sm:$0xff] }
 0x17b   : > { %5057 = vmatpush1.msra.mxu1 %v4938_v13  ;;  %v4930_v14 = vpop.permute.xlu1 %4929  ;;  %9440 = vmatmul.mubr.msk.f32.vlgmr.msra.gmra.mxu0 %vm356_vm1, %v9439_v4  ;;  %v1513_v46 = vpop.f32.mrf.mxu0 }
 0x17c   : > { %v4928_v16 = vpop.permute.xlu0 %4927  ;;  %9441 = vmatmul.mubr.msk.f32.vlgmr.msra.gmra.mxu1 %vm356_vm1, %v9439_v4  ;;  %5161 = vmatprep.mubr.f32.mxu0 %v9604_v0  ;;  %v1592_v50 = vadd.f32 %v1513_v46, %v1260_v22 }
 0x17d   : > { %7262 = vrot.lane.b32.xlu1 %v10168_v23, %s9625_s5  ;;  %v4941_v19 = vsel %vm4935_vm14, %v4928_v16, %v4930_v14  ;;  %v4940_v21 = vsel %vm4935_vm14, %v4926_v1, %v4928_v16  ;;  %5232 = vmatprep.mubr.f32.mxu1 %v9604_v0  ;;  %v1582_v43 = vpop.f32.mrf.mxu1 }
 0x17e   : > { %7260 = vrot.lane.b32.xlu0 %v10146_v9, %s9625_s5  ;;  %5127 = vmatprep.subr.mxu0 %v4941_v19  ;;  %v1593_v45 = vadd.f32 %v1582_v43, %v1261_v15 }
 0x17f   : > { %5128 = vmatpush1.msra.mxu0 %v4940_v21  ;;  %v4934_v29 = vpop.permute.xlu1 %4933  ;;  %v1584_v48 = vpop.f32.mrf.mxu1 }
 0x180   : > { %v4932_v33 = vpop.permute.xlu0 %4931  ;;  %9442 = vmatmul.mubr.msk.f32.vlgmr.msra.gmra.mxu0 %vm356_vm1, %v9439_v4  ;;  %v1594_v52 = vadd.f32 %v1584_v48, %v1262_v25 }
 0x181   : > { %7266 = vrot.lane.b32.xlu1 %v10174_v26, %s9625_s5  ;;  %v4943_v37 = vsel %vm4935_vm14, %v4932_v33, %v4934_v29  ;;  %v4942_v38 = vsel %vm4935_vm14, %v4930_v14, %v4932_v33  ;;  %5350 = vmatprep.mubr.f32.mxu0 %v9604_v0 }
 0x182   : > { %7264 = vrot.lane.b32.xlu0 %v10160_v20, %s9625_s5  ;;  %5198 = vmatprep.subr.mxu1 %v4943_v37 }
 0x183   : > { %5199 = vmatpush1.msra.mxu1 %v4942_v38  ;;  %v5254_v44 = vpop.permute.xlu1 %5253 }
 0x184   : > { %v5252_v47 = vpop.permute.xlu0 %5251  ;;  %9443 = vmatmul.mubr.msk.f32.vlgmr.msra.gmra.mxu1 %vm356_vm1, %v9439_v4  ;;  %v1701_v53 = vpop.f32.mrf.mxu0 }
 0x185   : > { %7268 = vrot.lane.b32.xlu1 %v10190_v34, %s9625_s5  ;;  %v5268_v49 = vsel %vm356_vm1, %v5252_v47, %v5254_v44  ;;  %5421 = vmatprep.mubr.f32.mxu1 %v9604_v0  ;;  %v10342_v54 = vadd.f32 %v1701_v53, %v1587_v27  ;;  %v1772_v55 = vpop.f32.mrf.mxu1 }
 0x186   : > { %7258 = vrot.lane.b32.xlu0 %v10154_v17, %s9625_s5  ;;  %5316 = vmatprep.subr.mxu0 %v5268_v49  ;;  %v1921_v57 = vadd.f32 %v1772_v55, %v1589_v30  ;;  %v1703_v58 = vpop.f32.mrf.mxu0 }
 0x187   : > { %v5258_v56 = vpop.permute.xlu1 %5257  ;;  %v10344_v60 = vadd.f32 %v1703_v58, %v1588_v35  ;;  %v1774_v2 = vpop.f32.mrf.mxu1 }
 0x188   : > { %v5256_v59 = vpop.permute.xlu0 %5255  ;;  %v1922_v63 = vadd.f32 %v1774_v2, %v1590_v40 }
 0x189   : > { %7272 = vrot.lane.b32.xlu1 %v10203_v39, %s9625_s5  ;;  %v5270_v61 = vsel %vm356_vm1, %v5256_v59, %v5258_v56  ;;  %v5269_v62 = vsel %vm356_vm1, %v5254_v44, %v5256_v59  ;;  %v1843_v1 = vpop.f32.mrf.mxu0  ;;  %v9449_v44 = vld [vmem:[%s10965_s0 + $0x80] sm:$0xff] }
 0x18a   : > { %7270 = vrot.lane.b32.xlu0 %v10183_v31, %s9625_s5  ;;  %5387 = vmatprep.subr.mxu1 %v5270_v61  ;;  %v10352_v4 = vadd.f32 %v1843_v1, %v1591_v42 }
 0x18b   : > { %5388 = vmatpush1.msra.mxu1 %v5269_v62  ;;  %v5260_v10 = vpop.permute.xlu1 %5259  ;;  %v1845_v11 = vpop.f32.mrf.mxu0 }
 0x18c   : > { %v5250_v3 = vpop.permute.xlu0 %5249  ;;  %9446 = vmatmul.mubr.msk.f32.vlgmr.msra.gmra.mxu1 %vm356_vm1, %v9444_v6  ;;  %v1924_v8 = vadd.f32 %v1845_v11, %v1592_v50  ;;  %v5271_v19 = vsel %vm356_vm1, %v5258_v56, %v5260_v10 }
 0x18d   : > { %v5267_v12 = vsel %vm356_vm1, %v5250_v3, %v5252_v47  ;;  %7592 = vrot.lane.b32.xlu1 %v10146_v9, %s9626_s8  ;;  %5563 = vmatprep.mubr.f32.mxu1 %v9604_v0  ;;  %v1914_v13 = vpop.f32.mrf.mxu1 }
 0x18e   : > { %7274 = vrot.lane.b32.xlu0 %v10231_v51, %s9625_s5  ;;  %5317 = vmatpush1.msra.mxu0 %v5267_v12  ;;  %v10364_v5 = vadd.f32 %v1914_v13, %v1593_v45 }
 0x18f   : > { %v5264_v14 = vpop.permute.xlu1 %5263  ;;  %9445 = vmatmul.mubr.msk.f32.vlgmr.msra.gmra.mxu0 %vm356_vm1, %v9444_v6  ;;  %v1916_v15 = vpop.f32.mrf.mxu1 }
 0x190   : > { %v5262_v7 = vpop.permute.xlu0 %5261  ;;  %5492 = vmatprep.mubr.f32.mxu0 %v9604_v0  ;;  %v10368_v16 = vadd.f32 %v1916_v15, %v1594_v52 }
 0x191   : > { %7596 = vrot.lane.b32.xlu1 %v10160_v20, %s9626_s8  ;;  %v5272_v18 = vsel %vm356_vm1, %v5260_v10, %v5262_v7  ;;  %v5273_v27 = vsel %vm356_vm1, %v5262_v7, %v5264_v14 }
 0x192   : > { %7594 = vrot.lane.b32.xlu0 %v10168_v23, %s9626_s8  ;;  %5458 = vmatprep.subr.mxu0 %v5272_v18  ;;  %v9454_v18 = vld [vmem:[%s10965_s0 + $0x88] sm:$0xff] }
 0x193   : > { %5459 = vmatpush1.msra.mxu0 %v5271_v19  ;;  %v5583_v21 = vpop.permute.xlu1 %5582 }
 0x194   : > { %v5266_v22 = vpop.permute.xlu0 %5265  ;;  %9447 = vmatmul.mubr.msk.f32.vlgmr.msra.gmra.mxu0 %vm356_vm1, %v9444_v6 }
 0x195   : > { %7590 = vrot.lane.b32.xlu1 %v10154_v17, %s9626_s8  ;;  %v5274_v24 = vsel %vm356_vm1, %v5264_v14, %v5266_v22  ;;  %5682 = vmatprep.mubr.f32.mxu0 %v9604_v0  ;;  %v2104_v25 = vpop.f32.mrf.mxu1 }
 0x196   : > { %7598 = vrot.lane.b32.xlu0 %v10174_v26, %s9626_s8  ;;  %5529 = vmatprep.subr.mxu1 %v5274_v24  ;;  %v10384_v28 = vadd.f32 %v2104_v25, %v1921_v57 }
 0x197   : > { %5530 = vmatpush1.msra.mxu1 %v5273_v27  ;;  %v5587_v29 = vpop.permute.xlu1 %5586  ;;  %v2106_v30 = vpop.f32.mrf.mxu1 }
 0x198   : > { %v5585_v32 = vpop.permute.xlu0 %5584  ;;  %9448 = vmatmul.mubr.msk.f32.vlgmr.msra.gmra.mxu1 %vm356_vm1, %v9444_v6  ;;  %v2033_v33 = vpop.f32.mrf.mxu0  ;;  %v10387_v35 = vadd.f32 %v2106_v30, %v1922_v63 }
 0x199   : > { %7602 = vrot.lane.b32.xlu1 %v10183_v31, %s9626_s8  ;;  %v5600_v36 = vsel %vm5598_vm15, %v5583_v21, %v5585_v32  ;;  %5753 = vmatprep.mubr.f32.mxu1 %v9604_v0  ;;  %v2251_v37 = vadd.f32 %v2033_v33, %v10342_v54  ;;  %v5601_v47 = vsel %vm5598_vm15, %v5585_v32, %v5587_v29 }
 0x19a   : > { %7600 = vrot.lane.b32.xlu0 %v10190_v34, %s9626_s8  ;;  %5648 = vmatprep.subr.mxu0 %v5600_v36  ;;  %v2035_v38 = vpop.f32.mrf.mxu0 }
 0x19b   : > { %v5581_v40 = vpop.permute.xlu1 %5580  ;;  %v2252_v41 = vadd.f32 %v2035_v38, %v10344_v60 }
 0x19c   : > { %v5599_v42 = vsel %vm5598_vm15, %v5581_v40, %v5583_v21  ;;  %v5589_v43 = vpop.permute.xlu0 %5588 }
 0x19d   : > { %7606 = vrot.lane.b32.xlu1 %v10231_v51, %s9626_s8  ;;  %5649 = vmatpush1.msra.mxu0 %v5599_v42  ;;  %v5602_v45 = vsel %vm5598_vm15, %v5587_v29, %v5589_v43  ;;  %v2175_v46 = vpop.f32.mrf.mxu0 }
 0x19e   : > { %7604 = vrot.lane.b32.xlu0 %v10203_v39, %s9626_s8  ;;  %5719 = vmatprep.subr.mxu1 %v5602_v45  ;;  %v2255_v48 = vadd.f32 %v2175_v46, %v10352_v4 }
 0x19f   : > { %5720 = vmatpush1.msra.mxu1 %v5601_v47  ;;  %v5593_v49 = vpop.permute.xlu1 %5592  ;;  %9450 = vmatmul.mubr.msk.f32.vlgmr.msra.gmra.mxu0 %vm356_vm1, %v9449_v44  ;;  %v2177_v50 = vpop.f32.mrf.mxu0 }
 0x1a0   : > { %v5591_v52 = vpop.permute.xlu0 %5590  ;;  %9451 = vmatmul.mubr.msk.f32.vlgmr.msra.gmra.mxu1 %vm356_vm1, %v9449_v44  ;;  %5824 = vmatprep.mubr.f32.mxu0 %v9604_v0  ;;  %v2256_v53 = vadd.f32 %v2177_v50, %v1924_v8 }
 0x1a1   : > { %v5603_v54 = vsel %vm5598_vm15, %v5589_v43, %v5591_v52  ;;  %7926 = vrot.lane.b32.xlu1 %v10168_v23, %s9627_s11  ;;  %v5604_v55 = vsel %vm5598_vm15, %v5591_v52, %v5593_v49  ;;  %5895 = vmatprep.mubr.f32.mxu1 %v9604_v0  ;;  %v2246_v56 = vpop.f32.mrf.mxu1 }
 0x1a2   : > { %7924 = vrot.lane.b32.xlu0 %v10146_v9, %s9627_s11  ;;  %5790 = vmatprep.subr.mxu0 %v5604_v55  ;;  %v2257_v57 = vadd.f32 %v2246_v56, %v10364_v5 }
 0x1a3   : > { %5791 = vmatpush1.msra.mxu0 %v5603_v54  ;;  %v5597_v58 = vpop.permute.xlu1 %5596  ;;  %v2248_v59 = vpop.f32.mrf.mxu1 }
 0x1a4   : > { %v5595_v60 = vpop.permute.xlu0 %5594  ;;  %9452 = vmatmul.mubr.msk.f32.vlgmr.msra.gmra.mxu0 %vm356_vm1, %v9449_v44  ;;  %v2258_v2 = vadd.f32 %v2248_v59, %v10368_v16  ;;  %v9459_v59 = vld [vmem:[%s10965_s0 + $0x90] sm:$0xff] }
 0x1a5   : > { %v5605_v61 = vsel %vm5598_vm15, %v5593_v49, %v5595_v60  ;;  %7930 = vrot.lane.b32.xlu1 %v10174_v26, %s9627_s11  ;;  %v5606_v62 = vsel %vm5598_vm15, %v5595_v60, %v5597_v58  ;;  %6014 = vmatprep.mubr.f32.mxu0 %v9604_v0 }
 0x1a6   : > { %7928 = vrot.lane.b32.xlu0 %v10160_v20, %s9627_s11  ;;  %5861 = vmatprep.subr.mxu1 %v5606_v62 }
 0x1a7   : > { %5862 = vmatpush1.msra.mxu1 %v5605_v61  ;;  %v5917_v63 = vpop.permute.xlu1 %5916 }
 0x1a8   : > { %v5915_v1 = vpop.permute.xlu0 %5914  ;;  %9453 = vmatmul.mubr.msk.f32.vlgmr.msra.gmra.mxu1 %vm356_vm1, %v9449_v44  ;;  %v2365_v4 = vpop.f32.mrf.mxu0 }
 0x1a9   : > { %7932 = vrot.lane.b32.xlu1 %v10190_v34, %s9627_s11  ;;  %v5932_v10 = vsel %vm5930_vm0, %v5915_v1, %v5917_v63  ;;  %6085 = vmatprep.mubr.f32.mxu1 %v9604_v0  ;;  %v10433_v6 = vadd.f32 %v2365_v4, %v2251_v37  ;;  %v2436_v3 = vpop.f32.mrf.mxu1 }
 0x1aa   : > { %7922 = vrot.lane.b32.xlu0 %v10154_v17, %s9627_s11  ;;  %5980 = vmatprep.subr.mxu0 %v5932_v10  ;;  %v2585_v11 = vadd.f32 %v2436_v3, %v10384_v28  ;;  %v2367_v12 = vpop.f32.mrf.mxu0 }
 0x1ab   : > { %v5921_v13 = vpop.permute.xlu1 %5920  ;;  %v10438_v8 = vadd.f32 %v2367_v12, %v2252_v41  ;;  %v2438_v5 = vpop.f32.mrf.mxu1 }
 0x1ac   : > { %v5919_v14 = vpop.permute.xlu0 %5918  ;;  %v2586_v15 = vadd.f32 %v2438_v5, %v10387_v35 }
 0x1ad   : > { %v5933_v7 = vsel %vm5930_vm0, %v5917_v63, %v5919_v14  ;;  %7936 = vrot.lane.b32.xlu1 %v10203_v39, %s9627_s11  ;;  %v5934_v16 = vsel %vm5930_vm0, %v5919_v14, %v5921_v13  ;;  %v2507_v19 = vpop.f32.mrf.mxu0 }
 0x1ae   : > { %7934 = vrot.lane.b32.xlu0 %v10183_v31, %s9627_s11  ;;  %6051 = vmatprep.subr.mxu1 %v5934_v16  ;;  %v10450_v21 = vadd.f32 %v2507_v19, %v2255_v48 }
 0x1af   : > { %6052 = vmatpush1.msra.mxu1 %v5933_v7  ;;  %v5923_v22 = vpop.permute.xlu1 %5922  ;;  %v2509_v24 = vpop.f32.mrf.mxu0 }
 0x1b0   : > { %9456 = vmatmul.mubr.msk.f32.vlgmr.msra.gmra.mxu1 %vm356_vm1, %v9454_v18  ;;  %v5913_v25 = vpop.permute.xlu0 %5912  ;;  %v10453_v27 = vadd.f32 %v2509_v24, %v2256_v53  ;;  %v5935_v38 = vsel %vm5930_vm0, %v5921_v13, %v5923_v22 }
 0x1b1   : > { %v5931_v28 = vsel %vm5930_vm0, %v5913_v25, %v5915_v1  ;;  %8256 = vrot.lane.b32.xlu1 %v10146_v9, %s9628_s18  ;;  %6227 = vmatprep.mubr.f32.mxu1 %v9604_v0  ;;  %v2578_v29 = vpop.f32.mrf.mxu1 }
 0x1b2   : > { %7938 = vrot.lane.b32.xlu0 %v10231_v51, %s9627_s11  ;;  %5981 = vmatpush1.msra.mxu0 %v5931_v28  ;;  %v10461_v30 = vadd.f32 %v2578_v29, %v2257_v57 }
 0x1b3   : > { %9455 = vmatmul.mubr.msk.f32.vlgmr.msra.gmra.mxu0 %vm356_vm1, %v9454_v18  ;;  %v5927_v32 = vpop.permute.xlu1 %5926  ;;  %v2580_v33 = vpop.f32.mrf.mxu1 }
 0x1b4   : > { %v5925_v35 = vpop.permute.xlu0 %5924  ;;  %6156 = vmatprep.mubr.f32.mxu0 %v9604_v0  ;;  %v10465_v36 = vadd.f32 %v2580_v33, %v2258_v2 }
 0x1b5   : > { %8260 = vrot.lane.b32.xlu1 %v10160_v20, %s9628_s18  ;;  %v5936_v37 = vsel %vm5930_vm0, %v5923_v22, %v5925_v35  ;;  %v5937_v44 = vsel %vm5930_vm0, %v5925_v35, %v5927_v32 }
 0x1b6   : > { %8258 = vrot.lane.b32.xlu0 %v10168_v23, %s9628_s18  ;;  %6122 = vmatprep.subr.mxu0 %v5936_v37 }
 0x1b7   : > { %6123 = vmatpush1.msra.mxu0 %v5935_v38  ;;  %v6265_v40 = vpop.permute.xlu1 %6264 }
 0x1b8   : > { %9457 = vmatmul.mubr.msk.f32.vlgmr.msra.gmra.mxu0 %vm356_vm1, %v9454_v18  ;;  %v5929_v41 = vpop.permute.xlu0 %5928 }
 0x1b9   : > { %8254 = vrot.lane.b32.xlu1 %v10154_v17, %s9628_s18  ;;  %v5938_v42 = vsel %vm5930_vm0, %v5927_v32, %v5929_v41  ;;  %6364 = vmatprep.mubr.f32.mxu0 %v9604_v0  ;;  %v2768_v43 = vpop.f32.mrf.mxu1 }
 0x1ba   : > { %8262 = vrot.lane.b32.xlu0 %v10174_v26, %s9628_s18  ;;  %6193 = vmatprep.subr.mxu1 %v5938_v42  ;;  %v10481_v45 = vadd.f32 %v2768_v43, %v2585_v11  ;;  %v9573_v43 = vld [vmem:[%s9675_s19 + $0x20] sm:$0xff] }
 0x1bb   : > { %6194 = vmatpush1.msra.mxu1 %v5937_v44  ;;  %v6269_v46 = vpop.permute.xlu1 %6268  ;;  %v2770_v47 = vpop.f32.mrf.mxu1 }
 0x1bc   : > { %9458 = vmatmul.mubr.msk.f32.vlgmr.msra.gmra.mxu1 %vm356_vm1, %v9454_v18  ;;  %v6267_v48 = vpop.permute.xlu0 %6266  ;;  %v2697_v49 = vpop.f32.mrf.mxu0  ;;  %v10484_v50 = vadd.f32 %v2770_v47, %v2586_v15  ;;  %v9574_v47 = vld [vmem:[%s9675_s19 + $0x18] sm:$0xff] }
 0x1bd   : > { %8266 = vrot.lane.b32.xlu1 %v10183_v31, %s9628_s18  ;;  %v6282_v52 = vsel %vm6280_vm2, %v6265_v40, %v6267_v48  ;;  %6435 = vmatprep.mubr.f32.mxu1 %v9604_v0  ;;  %v2915_v53 = vadd.f32 %v2697_v49, %v10433_v6  ;;  %v6283_v2 = vsel %vm6280_vm2, %v6267_v48, %v6269_v46 }
 0x1be   : > { %8264 = vrot.lane.b32.xlu0 %v10190_v34, %s9628_s18  ;;  %6330 = vmatprep.subr.mxu0 %v6282_v52  ;;  %v2699_v54 = vpop.f32.mrf.mxu0  ;;  %v9575_v52 = vld [vmem:[%s9675_s19 + $0x8] sm:$0xff] }
 0x1bf   : > { %v6263_v55 = vpop.permute.xlu1 %6262  ;;  %v2916_v56 = vadd.f32 %v2699_v54, %v10438_v8 }
 0x1c0   : > { %v6281_v57 = vsel %vm6280_vm2, %v6263_v55, %v6265_v40  ;;  %v6271_v58 = vpop.permute.xlu0 %6270  ;;  %v9576_v55 = vld [vmem:[%s9675_s19 + $0x28] sm:$0xff] }
 0x1c1   : > { %8270 = vrot.lane.b32.xlu1 %v10231_v51, %s9628_s18  ;;  %6331 = vmatpush1.msra.mxu0 %v6281_v57  ;;  %v6284_v60 = vsel %vm6280_vm2, %v6269_v46, %v6271_v58 }
 0x1c2   : > { %8268 = vrot.lane.b32.xlu0 %v10203_v39, %s9628_s18  ;;  %6401 = vmatprep.subr.mxu1 %v6284_v60  ;;  %v2839_v61 = vpop.f32.mrf.mxu0  ;;  %s10935_s18 = scalar_lea.vmem %s10968_s3, %s9508_s16 }
 0x1c3   : > { %9460 = vmatmul.mubr.msk.f32.vlgmr.msra.gmra.mxu0 %vm356_vm1, %v9459_v59  ;;  %6402 = vmatpush1.msra.mxu1 %v6283_v2  ;;  %v6275_v62 = vpop.permute.xlu1 %6274  ;;  %v2919_v63 = vadd.f32 %v2839_v61, %v10450_v21  ;;  %v9578_v61 = vld [vmem:[%s9675_s19 + $0x30] sm:$0xff] }
 0x1c4   : > { %9461 = vmatmul.mubr.msk.f32.vlgmr.msra.gmra.mxu1 %vm356_vm1, %v9459_v59  ;;  %v6273_v1 = vpop.permute.xlu0 %6272  ;;  %6506 = vmatprep.mubr.f32.mxu0 %v9604_v0  ;;  %v2841_v4 = vpop.f32.mrf.mxu0 }
 0x1c5   : > { %v6285_v10 = vsel %vm6280_vm2, %v6271_v58, %v6273_v1  ;;  %8590 = vrot.lane.b32.xlu1 %v10168_v23, %s9629_s22  ;;  %v6286_v6 = vsel %vm6280_vm2, %v6273_v1, %v6275_v62  ;;  %6577 = vmatprep.mubr.f32.mxu1 %v9604_v0  ;;  %v2920_v3 = vadd.f32 %v2841_v4, %v10453_v27 }
 0x1c6   : > { %8588 = vrot.lane.b32.xlu0 %v10146_v9, %s9629_s22  ;;  %6472 = vmatprep.subr.mxu0 %v6286_v6  ;;  %v2910_v11 = vpop.f32.mrf.mxu1 }
 0x1c7   : > { %6473 = vmatpush1.msra.mxu0 %v6285_v10  ;;  %v6279_v12 = vpop.permute.xlu1 %6278  ;;  %v2921_v13 = vadd.f32 %v2910_v11, %v10461_v30 }
 0x1c8   : > { %9462 = vmatmul.mubr.msk.f32.vlgmr.msra.gmra.mxu0 %vm356_vm1, %v9459_v59  ;;  %v6277_v8 = vpop.permute.xlu0 %6276  ;;  %v2912_v5 = vpop.f32.mrf.mxu1 }
 0x1c9   : > { %v6287_v23 = vsel %vm6280_vm2, %v6275_v62, %v6277_v8  ;;  %8594 = vrot.lane.b32.xlu1 %v10174_v26, %s9629_s22  ;;  %v6288_v14 = vsel %vm6280_vm2, %v6277_v8, %v6279_v12  ;;  %6696 = vmatprep.mubr.f32.mxu0 %v9604_v0  ;;  %v2922_v9 = vadd.f32 %v2912_v5, %v10465_v36  ;;  %v9572_v36 = vld [vmem:[%s9675_s19 + $0x10] sm:$0xff]  ;;  %v9579_v5 = vld [vmem:[%s9712_s24] sm:$0xff] }
 0x1ca   : > { %8592 = vrot.lane.b32.xlu0 %v10160_v20, %s9629_s22  ;;  %6543 = vmatprep.subr.mxu1 %v6288_v14 }
 0x1cb   : > { %6544 = vmatpush1.msra.mxu1 %v6287_v23  ;;  %v6599_v15 = vpop.permute.xlu1 %6598 }
 0x1cc   : > { %9463 = vmatmul.mubr.msk.f32.vlgmr.msra.gmra.mxu1 %vm356_vm1, %v9459_v59  ;;  %v6597_v7 = vpop.permute.xlu0 %6596  ;;  %v9577_v59 = vld [vmem:[%s9675_s19 + $0x38] sm:$0xff] }
 0x1cd   : > { %8596 = vrot.lane.b32.xlu1 %v10190_v34, %s9629_s22  ;;  %v6614_v26 = vsel %vm6612_vm3, %v6597_v7, %v6599_v15  ;;  %6767 = vmatprep.mubr.f32.mxu1 %v9604_v0 }
 0x1ce   : > { %8586 = vrot.lane.b32.xlu0 %v10154_v17, %s9629_s22  ;;  %6662 = vmatprep.subr.mxu0 %v6614_v26  ;;  %v3029_v16 = vpop.f32.mrf.mxu0  ;;  %v9464_v17 = vld [vmem:[%s10965_s0 + $0x98] sm:$0xff] }
 0x1cf   : > { %v6603_v20 = vpop.permute.xlu1 %6602  ;;  %v10533_v18 = vadd.f32 %v3029_v16, %v2915_v53  ;;  %v3100_v19 = vpop.f32.mrf.mxu1 }
 0x1d0   : > { %v6601_v21 = vpop.permute.xlu0 %6600  ;;  %v10536_v22 = vadd.f32 %v3100_v19, %v10481_v45  ;;  %v3031_v24 = vpop.f32.mrf.mxu0 }
 0x1d1   : > { %v6615_v34 = vsel %vm6612_vm3, %v6599_v15, %v6601_v21  ;;  %8600 = vrot.lane.b32.xlu1 %v10203_v39, %s9629_s22  ;;  %v6616_v25 = vsel %vm6612_vm3, %v6601_v21, %v6603_v20  ;;  %v10545_v27 = vadd.f32 %v3031_v24, %v2916_v56  ;;  %v3102_v28 = vpop.f32.mrf.mxu1 }
 0x1d2   : > { %8598 = vrot.lane.b32.xlu0 %v10183_v31, %s9629_s22  ;;  %6733 = vmatprep.subr.mxu1 %v6616_v25  ;;  %v3250_v29 = vadd.f32 %v3102_v28, %v10484_v50 }
 0x1d3   : > { %6734 = vmatpush1.msra.mxu1 %v6615_v34  ;;  %v6605_v30 = vpop.permute.xlu1 %6604  ;;  %v3171_v32 = vpop.f32.mrf.mxu0 }
 0x1d4   : > { %9466 = vmatmul.mubr.msk.f32.vlgmr.msra.gmra.mxu1 %vm356_vm1, %v9464_v17  ;;  %v6595_v39 = vpop.permute.xlu0 %6594  ;;  %v10551_v33 = vadd.f32 %v3171_v32, %v2919_v63  ;;  %v6617_v46 = vsel %vm6612_vm3, %v6603_v20, %v6605_v30 }
 0x1d5   : > { %v6613_v35 = vsel %vm6612_vm3, %v6595_v39, %v6597_v7  ;;  %8920 = vrot.lane.b32.xlu1 %v9572_v36, %s9630_s26  ;;  %6909 = vmatprep.mubr.f32.mxu1 %v9604_v0  ;;  %v3173_v31 = vpop.f32.mrf.mxu0 }
 0x1d6   : > { %8602 = vrot.lane.b32.xlu0 %v10231_v51, %s9629_s22  ;;  %6663 = vmatpush1.msra.mxu0 %v6613_v35  ;;  %v10559_v37 = vadd.f32 %v3173_v31, %v2920_v3  ;;  %v9469_v3 = vld [vmem:[%s10965_s0 + $0xa0] sm:$0xff] }
 0x1d7   : > { %9465 = vmatmul.mubr.msk.f32.vlgmr.msra.gmra.mxu0 %vm356_vm1, %v9464_v17  ;;  %v6609_v38 = vpop.permute.xlu1 %6608  ;;  %v3242_v40 = vpop.f32.mrf.mxu1 }
 0x1d8   : > { %v6607_v41 = vpop.permute.xlu0 %6606  ;;  %6838 = vmatprep.mubr.f32.mxu0 %v9604_v0  ;;  %v10563_v42 = vadd.f32 %v3242_v40, %v2921_v13 }
 0x1d9   : > { %8924 = vrot.lane.b32.xlu1 %v9573_v43, %s9630_s26  ;;  %v6618_v44 = vsel %vm6612_vm3, %v6605_v30, %v6607_v41  ;;  %v3244_v45 = vpop.f32.mrf.mxu1  ;;  %v6619_v54 = vsel %vm6612_vm3, %v6607_v41, %v6609_v38 }
 0x1da   : > { %8922 = vrot.lane.b32.xlu0 %v9574_v47, %s9630_s26  ;;  %6804 = vmatprep.subr.mxu0 %v6618_v44  ;;  %v10571_v48 = vadd.f32 %v3244_v45, %v2922_v9 }
 0x1db   : > { %6805 = vmatpush1.msra.mxu0 %v6617_v46  ;;  %v6929_v49 = vpop.permute.xlu1 %6928 }
 0x1dc   : > { %9467 = vmatmul.mubr.msk.f32.vlgmr.msra.gmra.mxu0 %vm356_vm1, %v9464_v17  ;;  %v6611_v50 = vpop.permute.xlu0 %6610 }
 0x1dd   : > { %8918 = vrot.lane.b32.xlu1 %v9575_v52, %s9630_s26  ;;  %v6620_v53 = vsel %vm6612_vm3, %v6609_v38, %v6611_v50  ;;  %7028 = vmatprep.mubr.f32.mxu0 %v9604_v0 }
 0x1de   : > { %8926 = vrot.lane.b32.xlu0 %v9576_v55, %s9630_s26  ;;  %6875 = vmatprep.subr.mxu1 %v6620_v53 }
 0x1df   : > { %6876 = vmatpush1.msra.mxu1 %v6619_v54  ;;  %v6933_v56 = vpop.permute.xlu1 %6932 }
 0x1e0   : > { %9468 = vmatmul.mubr.msk.f32.vlgmr.msra.gmra.mxu1 %vm356_vm1, %v9464_v17  ;;  %v6931_v57 = vpop.permute.xlu0 %6930  ;;  %v3432_v58 = vpop.f32.mrf.mxu1 }
 0x1e1   : > { %8930 = vrot.lane.b32.xlu1 %v9577_v59, %s9630_s26  ;;  %v6946_v60 = vsel %vm6944_vm4, %v6929_v49, %v6931_v57  ;;  %7099 = vmatprep.mubr.f32.mxu1 %v9604_v0  ;;  %v10587_v2 = vadd.f32 %v3432_v58, %v10536_v22  ;;  %v6947_v8 = vsel %vm6944_vm4, %v6931_v57, %v6933_v56 }
 0x1e2   : > { %8928 = vrot.lane.b32.xlu0 %v9578_v61, %s9630_s26  ;;  %6994 = vmatprep.subr.mxu0 %v6946_v60  ;;  %v3434_v62 = vpop.f32.mrf.mxu1 }
 0x1e3   : > { %v6927_v63 = vpop.permute.xlu1 %6926  ;;  %v3361_v1 = vpop.f32.mrf.mxu0  ;;  %v10591_v4 = vadd.f32 %v3434_v62, %v3250_v29 }
 0x1e4   : > { %v6945_v10 = vsel %vm6944_vm4, %v6927_v63, %v6929_v49  ;;  %v6935_v6 = vpop.permute.xlu0 %6934  ;;  %v3579_v11 = vadd.f32 %v3361_v1, %v10533_v18 }
 0x1e5   : > { %8934 = vrot.lane.b32.xlu1 %v10231_v51, %s9630_s26  ;;  %6995 = vmatpush1.msra.mxu0 %v6945_v10  ;;  %v6948_v12 = vsel %vm6944_vm4, %v6933_v56, %v6935_v6  ;;  %v3363_v13 = vpop.f32.mrf.mxu0 }
 0x1e6   : > { %8932 = vrot.lane.b32.xlu0 %v9579_v5, %s9630_s26  ;;  %7065 = vmatprep.subr.mxu1 %v6948_v12  ;;  %v3580_v23 = vadd.f32 %v3363_v13, %v10545_v27  ;;  %v9479_v12 = vld [vmem:[%s10965_s0 + $0xb0] sm:$0xff] }
 0x1e7   : > { %9470 = vmatmul.mubr.msk.f32.vlgmr.msra.gmra.mxu0 %vm356_vm1, %v9469_v3  ;;  %7066 = vmatpush1.msra.mxu1 %v6947_v8  ;;  %v6939_v14 = vpop.permute.xlu1 %6938 }
 0x1e8   : > { %9471 = vmatmul.mubr.msk.f32.vlgmr.msra.gmra.mxu1 %vm356_vm1, %v9469_v3  ;;  %v6937_v9 = vpop.permute.xlu0 %6936  ;;  %7170 = vmatprep.mubr.f32.mxu0 %v9604_v0  ;;  %v3503_v51 = vpop.f32.mrf.mxu0 }
 0x1e9   : > { %v6949_v15 = vsel %vm6944_vm4, %v6935_v6, %v6937_v9  ;;  %v6950_v7 = vsel %vm6944_vm4, %v6937_v9, %v6939_v14  ;;  %7241 = vmatprep.mubr.f32.mxu1 %v9604_v0  ;;  %v3583_v26 = vadd.f32 %v3503_v51, %v10551_v33 }
 0x1ea   : > { %7136 = vmatprep.subr.mxu0 %v6950_v7  ;;  %v3505_v16 = vpop.f32.mrf.mxu0 }
 0x1eb   : > { %7137 = vmatpush1.msra.mxu0 %v6949_v15  ;;  %v6943_v20 = vpop.permute.xlu1 %6942  ;;  %v3584_v18 = vadd.f32 %v3505_v16, %v10559_v37  ;;  %v9474_v37 = vld [vmem:[%s10965_s0 + $0xa8] sm:$0xff] }
 0x1ec   : > { %9472 = vmatmul.mubr.msk.f32.vlgmr.msra.gmra.mxu0 %vm356_vm1, %v9469_v3  ;;  %v6941_v19 = vpop.permute.xlu0 %6940  ;;  %v3574_v21 = vpop.f32.mrf.mxu1 }
 0x1ed   : > { %v6951_v22 = vsel %vm6944_vm4, %v6939_v14, %v6941_v19  ;;  %v6952_v24 = vsel %vm6944_vm4, %v6941_v19, %v6943_v20  ;;  %7360 = vmatprep.mubr.f32.mxu0 %v9604_v0  ;;  %v3585_v34 = vadd.f32 %v3574_v21, %v10563_v42 }
 0x1ee   : > { %7207 = vmatprep.subr.mxu1 %v6952_v24  ;;  %v3576_v25 = vpop.f32.mrf.mxu1 }
 0x1ef   : > { %7208 = vmatpush1.msra.mxu1 %v6951_v22  ;;  %v7263_v17 = vpop.permute.xlu1 %7262  ;;  %v3586_v27 = vadd.f32 %v3576_v25, %v10571_v48 }
 0x1f0   : > { %9473 = vmatmul.mubr.msk.f32.vlgmr.msra.gmra.mxu1 %vm356_vm1, %v9469_v3  ;;  %v7261_v28 = vpop.permute.xlu0 %7260 }
 0x1f1   : > { %v7278_v29 = vsel %vm7276_vm5, %v7261_v28, %v7263_v17  ;;  %7431 = vmatprep.mubr.f32.mxu1 %v9604_v0 }
 0x1f2   : > { %7326 = vmatprep.subr.mxu0 %v7278_v29 }
 0x1f3   : > { %v7267_v30 = vpop.permute.xlu1 %7266  ;;  %v3693_v32 = vpop.f32.mrf.mxu0 }
 0x1f4   : > { %v7265_v39 = vpop.permute.xlu0 %7264  ;;  %v3911_v33 = vadd.f32 %v3693_v32, %v3579_v11  ;;  %v3764_v35 = vpop.f32.mrf.mxu1 }
 0x1f5   : > { %v7279_v36 = vsel %vm7276_vm5, %v7263_v17, %v7265_v39  ;;  %v7280_v31 = vsel %vm7276_vm5, %v7265_v39, %v7267_v30  ;;  %v3913_v38 = vadd.f32 %v3764_v35, %v10587_v2  ;;  %v3695_v40 = vpop.f32.mrf.mxu0 }
 0x1f6   : > { %7397 = vmatprep.subr.mxu1 %v7280_v31  ;;  %v3912_v41 = vadd.f32 %v3695_v40, %v3580_v23  ;;  %v3766_v42 = vpop.f32.mrf.mxu1 }
 0x1f7   : > { %7398 = vmatpush1.msra.mxu1 %v7279_v36  ;;  %v7269_v43 = vpop.permute.xlu1 %7268  ;;  %v3914_v44 = vadd.f32 %v3766_v42, %v10591_v4 }
 0x1f8   : > { %9476 = vmatmul.mubr.msk.f32.vlgmr.msra.gmra.mxu1 %vm356_vm1, %v9474_v37  ;;  %v7259_v45 = vpop.permute.xlu0 %7258  ;;  %v3835_v46 = vpop.f32.mrf.mxu0  ;;  %v7281_v57 = vsel %vm7276_vm5, %v7267_v30, %v7269_v43 }
 0x1f9   : > { %v7277_v47 = vsel %vm7276_vm5, %v7259_v45, %v7261_v28  ;;  %7573 = vmatprep.mubr.f32.mxu1 %v9604_v0  ;;  %v3915_v48 = vadd.f32 %v3835_v46, %v3583_v26 }
 0x1fa   : > { %7327 = vmatpush1.msra.mxu0 %v7277_v47  ;;  %v3837_v49 = vpop.f32.mrf.mxu0 }
 0x1fb   : > { %9475 = vmatmul.mubr.msk.f32.vlgmr.msra.gmra.mxu0 %vm356_vm1, %v9474_v37  ;;  %v7273_v50 = vpop.permute.xlu1 %7272  ;;  %v3916_v52 = vadd.f32 %v3837_v49, %v3584_v18 }
 0x1fc   : > { %v7271_v53 = vpop.permute.xlu0 %7270  ;;  %7502 = vmatprep.mubr.f32.mxu0 %v9604_v0  ;;  %v3906_v54 = vpop.f32.mrf.mxu1 }
 0x1fd   : > { %v7282_v55 = vsel %vm7276_vm5, %v7269_v43, %v7271_v53  ;;  %v3917_v56 = vadd.f32 %v3906_v54, %v3585_v34  ;;  %v7283_v62 = vsel %vm7276_vm5, %v7271_v53, %v7273_v50  ;;  %v9484_v43 = vld [vmem:[%s10965_s0 + $0xb8] sm:$0xff] }
 0x1fe   : > { %7468 = vmatprep.subr.mxu0 %v7282_v55  ;;  %v3908_v58 = vpop.f32.mrf.mxu1 }
 0x1ff   : > { %7469 = vmatpush1.msra.mxu0 %v7281_v57  ;;  %v7593_v59 = vpop.permute.xlu1 %7592  ;;  %v3918_v60 = vadd.f32 %v3908_v58, %v3586_v27 }
 0x200   : > { %9477 = vmatmul.mubr.msk.f32.vlgmr.msra.gmra.mxu0 %vm356_vm1, %v9474_v37  ;;  %v7275_v2 = vpop.permute.xlu0 %7274 }
 0x201   : > { %v7284_v61 = vsel %vm7276_vm5, %v7273_v50, %v7275_v2  ;;  %7692 = vmatprep.mubr.f32.mxu0 %v9604_v0 }
 0x202   : > { %7539 = vmatprep.subr.mxu1 %v7284_v61 }
 0x203   : > { %7540 = vmatpush1.msra.mxu1 %v7283_v62  ;;  %v7597_v63 = vpop.permute.xlu1 %7596 }
 0x204   : > { %9478 = vmatmul.mubr.msk.f32.vlgmr.msra.gmra.mxu1 %vm356_vm1, %v9474_v37  ;;  %v7595_v1 = vpop.permute.xlu0 %7594  ;;  %v4096_v4 = vpop.f32.mrf.mxu1 }
 0x205   : > { %v7610_v10 = vsel %vm7608_vm6, %v7593_v59, %v7595_v1  ;;  %7763 = vmatprep.mubr.f32.mxu1 %v9604_v0  ;;  %v4245_v6 = vadd.f32 %v4096_v4, %v3913_v38  ;;  %v7611_v15 = vsel %vm7608_vm6, %v7595_v1, %v7597_v63 }
 0x206   : > { %7658 = vmatprep.subr.mxu0 %v7610_v10  ;;  %v4098_v3 = vpop.f32.mrf.mxu1 }
 0x207   : > { %v7591_v11 = vpop.permute.xlu1 %7590  ;;  %v4025_v13 = vpop.f32.mrf.mxu0  ;;  %v4246_v8 = vadd.f32 %v4098_v3, %v3914_v44 }
 0x208   : > { %v7609_v5 = vsel %vm7608_vm6, %v7591_v11, %v7593_v59  ;;  %v7599_v23 = vpop.permute.xlu0 %7598  ;;  %v4243_v14 = vadd.f32 %v4025_v13, %v3911_v33 }
 0x209   : > { %7659 = vmatpush1.msra.mxu0 %v7609_v5  ;;  %v7612_v9 = vsel %vm7608_vm6, %v7597_v63, %v7599_v23  ;;  %v4027_v51 = vpop.f32.mrf.mxu0 }
 0x20a   : > { %7729 = vmatprep.subr.mxu1 %v7612_v9  ;;  %9480 = vmatmul.mubr.msk.f32.vlgmr.msra.gmra.mxu0 %vm356_vm1, %v9479_v12  ;;  %v4244_v7 = vadd.f32 %v4027_v51, %v3912_v41 }
 0x20b   : > { %7730 = vmatpush1.msra.mxu1 %v7611_v15  ;;  %v7603_v26 = vpop.permute.xlu1 %7602  ;;  %7834 = vmatprep.mubr.f32.mxu0 %v9604_v0 }
 0x20c   : > { %9481 = vmatmul.mubr.msk.f32.vlgmr.msra.gmra.mxu1 %vm356_vm1, %v9479_v12  ;;  %v7601_v16 = vpop.permute.xlu0 %7600  ;;  %v4167_v20 = vpop.f32.mrf.mxu0 }
 0x20d   : > { %v7613_v18 = vsel %vm7608_vm6, %v7599_v23, %v7601_v16  ;;  %v7614_v19 = vsel %vm7608_vm6, %v7601_v16, %v7603_v26  ;;  %7905 = vmatprep.mubr.f32.mxu1 %v9604_v0  ;;  %v4247_v21 = vadd.f32 %v4167_v20, %v3915_v48 }
 0x20e   : > { %7800 = vmatprep.subr.mxu0 %v7614_v19  ;;  %v4169_v22 = vpop.f32.mrf.mxu0 }
 0x20f   : > { %7801 = vmatpush1.msra.mxu0 %v7613_v18  ;;  %v7607_v24 = vpop.permute.xlu1 %7606  ;;  %v4248_v34 = vadd.f32 %v4169_v22, %v3916_v52 }
 0x210   : > { %9482 = vmatmul.mubr.msk.f32.vlgmr.msra.gmra.mxu0 %vm356_vm1, %v9479_v12  ;;  %v7605_v25 = vpop.permute.xlu0 %7604  ;;  %v4238_v17 = vpop.f32.mrf.mxu1 }
 0x211   : > { %v7615_v27 = vsel %vm7608_vm6, %v7603_v26, %v7605_v25  ;;  %v7616_v28 = vsel %vm7608_vm6, %v7605_v25, %v7607_v24  ;;  %8024 = vmatprep.mubr.f32.mxu0 %v9604_v0  ;;  %v4249_v29 = vadd.f32 %v4238_v17, %v3917_v56 }
 0x212   : > { %7871 = vmatprep.subr.mxu1 %v7616_v28  ;;  %v4240_v30 = vpop.f32.mrf.mxu1 }
 0x213   : > { %7872 = vmatpush1.msra.mxu1 %v7615_v27  ;;  %v7927_v32 = vpop.permute.xlu1 %7926  ;;  %v4250_v39 = vadd.f32 %v4240_v30, %v3918_v60 }
 0x214   : > { %9483 = vmatmul.mubr.msk.f32.vlgmr.msra.gmra.mxu1 %vm356_vm1, %v9479_v12  ;;  %v7925_v33 = vpop.permute.xlu0 %7924 }
 0x215   : > { %v7942_v35 = vsel %vm7940_vm7, %v7925_v33, %v7927_v32  ;;  %8095 = vmatprep.mubr.f32.mxu1 %v9604_v0 }
 0x216   : > { %7990 = vmatprep.subr.mxu0 %v7942_v35 }
 0x217   : > { %v7931_v36 = vpop.permute.xlu1 %7930  ;;  %v4357_v31 = vpop.f32.mrf.mxu0 }
 0x218   : > { %v7929_v37 = vpop.permute.xlu0 %7928  ;;  %v4575_v38 = vadd.f32 %v4357_v31, %v4243_v14  ;;  %v4428_v40 = vpop.f32.mrf.mxu1  ;;  %v9489_v14 = vld [vmem:[%s10965_s0 + $0xc0] sm:$0xff] }
 0x219   : > { %v7943_v41 = vsel %vm7940_vm7, %v7927_v32, %v7929_v37  ;;  %v7944_v42 = vsel %vm7940_vm7, %v7929_v37, %v7931_v36  ;;  %v4577_v44 = vadd.f32 %v4428_v40, %v4245_v6  ;;  %v4359_v45 = vpop.f32.mrf.mxu0 }
 0x21a   : > { %8061 = vmatprep.subr.mxu1 %v7944_v42  ;;  %v4576_v46 = vadd.f32 %v4359_v45, %v4244_v7  ;;  %v4430_v47 = vpop.f32.mrf.mxu1 }
 0x21b   : > { %8062 = vmatpush1.msra.mxu1 %v7943_v41  ;;  %v7933_v48 = vpop.permute.xlu1 %7932  ;;  %v4578_v49 = vadd.f32 %v4430_v47, %v4246_v8 }
 0x21c   : > { %9486 = vmatmul.mubr.msk.f32.vlgmr.msra.gmra.mxu1 %vm356_vm1, %v9484_v43  ;;  %v7923_v50 = vpop.permute.xlu0 %7922  ;;  %v4499_v52 = vpop.f32.mrf.mxu0  ;;  %v7945_v61 = vsel %vm7940_vm7, %v7931_v36, %v7933_v48 }
 0x21d   : > { %v7941_v53 = vsel %vm7940_vm7, %v7923_v50, %v7925_v33  ;;  %8237 = vmatprep.mubr.f32.mxu1 %v9604_v0  ;;  %v4579_v54 = vadd.f32 %v4499_v52, %v4247_v21 }
 0x21e   : > { %7991 = vmatpush1.msra.mxu0 %v7941_v53  ;;  %v4501_v55 = vpop.f32.mrf.mxu0 }
 0x21f   : > { %9485 = vmatmul.mubr.msk.f32.vlgmr.msra.gmra.mxu0 %vm356_vm1, %v9484_v43  ;;  %v7937_v56 = vpop.permute.xlu1 %7936  ;;  %v4580_v57 = vadd.f32 %v4501_v55, %v4248_v34 }
 0x220   : > { %v7935_v58 = vpop.permute.xlu0 %7934  ;;  %8166 = vmatprep.mubr.f32.mxu0 %v9604_v0  ;;  %v4570_v59 = vpop.f32.mrf.mxu1 }
 0x221   : > { %v7946_v60 = vsel %vm7940_vm7, %v7933_v48, %v7935_v58  ;;  %v4581_v2 = vadd.f32 %v4570_v59, %v4249_v29  ;;  %v7947_v6 = vsel %vm7940_vm7, %v7935_v58, %v7937_v56  ;;  %v9494_v48 = vld [vmem:[%s10965_s0 + $0xc8] sm:$0xff] }
 0x222   : > { %8132 = vmatprep.subr.mxu0 %v7946_v60  ;;  %v4572_v62 = vpop.f32.mrf.mxu1 }
 0x223   : > { %8133 = vmatpush1.msra.mxu0 %v7945_v61  ;;  %v8257_v63 = vpop.permute.xlu1 %8256  ;;  %v4582_v1 = vadd.f32 %v4572_v62, %v4250_v39 }
 0x224   : > { %9487 = vmatmul.mubr.msk.f32.vlgmr.msra.gmra.mxu0 %vm356_vm1, %v9484_v43  ;;  %v7939_v4 = vpop.permute.xlu0 %7938 }
 0x225   : > { %v7948_v10 = vsel %vm7940_vm7, %v7937_v56, %v7939_v4  ;;  %8356 = vmatprep.mubr.f32.mxu0 %v9604_v0 }
 0x226   : > { %8203 = vmatprep.subr.mxu1 %v7948_v10 }
 0x227   : > { %8204 = vmatpush1.msra.mxu1 %v7947_v6  ;;  %v8261_v3 = vpop.permute.xlu1 %8260 }
 0x228   : > { %9488 = vmatmul.mubr.msk.f32.vlgmr.msra.gmra.mxu1 %vm356_vm1, %v9484_v43  ;;  %v8259_v11 = vpop.permute.xlu0 %8258  ;;  %v4760_v12 = vpop.f32.mrf.mxu1 }
 0x229   : > { %v8274_v13 = vsel %vm8272_vm8, %v8257_v63, %v8259_v11  ;;  %8427 = vmatprep.mubr.f32.mxu1 %v9604_v0  ;;  %v4909_v8 = vadd.f32 %v4760_v12, %v4577_v44  ;;  %v8275_v18 = vsel %vm8272_vm8, %v8259_v11, %v8261_v3 }
 0x22a   : > { %8322 = vmatprep.subr.mxu0 %v8274_v13  ;;  %v4762_v5 = vpop.f32.mrf.mxu1 }
 0x22b   : > { %v8255_v23 = vpop.permute.xlu1 %8254  ;;  %v4689_v9 = vpop.f32.mrf.mxu0  ;;  %v4910_v51 = vadd.f32 %v4762_v5, %v4578_v49 }
 0x22c   : > { %v8273_v15 = vsel %vm8272_vm8, %v8255_v23, %v8257_v63  ;;  %v8263_v7 = vpop.permute.xlu0 %8262  ;;  %v4907_v26 = vadd.f32 %v4689_v9, %v4575_v38 }
 0x22d   : > { %8323 = vmatpush1.msra.mxu0 %v8273_v15  ;;  %v8276_v16 = vsel %vm8272_vm8, %v8261_v3, %v8263_v7  ;;  %v4691_v20 = vpop.f32.mrf.mxu0 }
 0x22e   : > { %8393 = vmatprep.subr.mxu1 %v8276_v16  ;;  %9490 = vmatmul.mubr.msk.f32.vlgmr.msra.gmra.mxu0 %vm356_vm1, %v9489_v14  ;;  %v4908_v19 = vadd.f32 %v4691_v20, %v4576_v46 }
 0x22f   : > { %8394 = vmatpush1.msra.mxu1 %v8275_v18  ;;  %v8267_v21 = vpop.permute.xlu1 %8266  ;;  %8498 = vmatprep.mubr.f32.mxu0 %v9604_v0 }
 0x230   : > { %9491 = vmatmul.mubr.msk.f32.vlgmr.msra.gmra.mxu1 %vm356_vm1, %v9489_v14  ;;  %v8265_v22 = vpop.permute.xlu0 %8264  ;;  %v4831_v24 = vpop.f32.mrf.mxu0 }
 0x231   : > { %v8277_v34 = vsel %vm8272_vm8, %v8263_v7, %v8265_v22  ;;  %v8278_v25 = vsel %vm8272_vm8, %v8265_v22, %v8267_v21  ;;  %8569 = vmatprep.mubr.f32.mxu1 %v9604_v0  ;;  %v4911_v17 = vadd.f32 %v4831_v24, %v4579_v54 }
 0x232   : > { %8464 = vmatprep.subr.mxu0 %v8278_v25  ;;  %v4833_v27 = vpop.f32.mrf.mxu0 }
 0x233   : > { %8465 = vmatpush1.msra.mxu0 %v8277_v34  ;;  %v8271_v28 = vpop.permute.xlu1 %8270  ;;  %v4912_v29 = vadd.f32 %v4833_v27, %v4580_v57 }
 0x234   : > { %9492 = vmatmul.mubr.msk.f32.vlgmr.msra.gmra.mxu0 %vm356_vm1, %v9489_v14  ;;  %v8269_v30 = vpop.permute.xlu0 %8268  ;;  %v4902_v32 = vpop.f32.mrf.mxu1 }
 0x235   : > { %v8279_v39 = vsel %vm8272_vm8, %v8267_v21, %v8269_v30  ;;  %v8280_v33 = vsel %vm8272_vm8, %v8269_v30, %v8271_v28  ;;  %8688 = vmatprep.mubr.f32.mxu0 %v9604_v0  ;;  %v4913_v35 = vadd.f32 %v4902_v32, %v4581_v2 }
 0x236   : > { %8535 = vmatprep.subr.mxu1 %v8280_v33  ;;  %v4904_v36 = vpop.f32.mrf.mxu1 }
 0x237   : > { %8536 = vmatpush1.msra.mxu1 %v8279_v39  ;;  %v8591_v31 = vpop.permute.xlu1 %8590  ;;  %v4914_v37 = vadd.f32 %v4904_v36, %v4582_v1 }
 0x238   : > { %9493 = vmatmul.mubr.msk.f32.vlgmr.msra.gmra.mxu1 %vm356_vm1, %v9489_v14  ;;  %v8589_v38 = vpop.permute.xlu0 %8588 }
 0x239   : > { %v8606_v40 = vsel %vm8604_vm9, %v8589_v38, %v8591_v31  ;;  %8759 = vmatprep.mubr.f32.mxu1 %v9604_v0 }
 0x23a   : > { %8654 = vmatprep.subr.mxu0 %v8606_v40 }
 0x23b   : > { %v8595_v41 = vpop.permute.xlu1 %8594  ;;  %v5021_v42 = vpop.f32.mrf.mxu0 }
 0x23c   : > { %v8593_v43 = vpop.permute.xlu0 %8592  ;;  %v5239_v44 = vadd.f32 %v5021_v42, %v4907_v26  ;;  %v5092_v45 = vpop.f32.mrf.mxu1  ;;  %v9499_v26 = vld [vmem:[%s10965_s0 + $0xd0] sm:$0xff] }
 0x23d   : > { %v8607_v46 = vsel %vm8604_vm9, %v8591_v31, %v8593_v43  ;;  %v8608_v47 = vsel %vm8604_vm9, %v8593_v43, %v8595_v41  ;;  %v5241_v49 = vadd.f32 %v5092_v45, %v4909_v8  ;;  %v5023_v50 = vpop.f32.mrf.mxu0 }
 0x23e   : > { %8725 = vmatprep.subr.mxu1 %v8608_v47  ;;  %v5240_v52 = vadd.f32 %v5023_v50, %v4908_v19  ;;  %v5094_v53 = vpop.f32.mrf.mxu1 }
 0x23f   : > { %8726 = vmatpush1.msra.mxu1 %v8607_v46  ;;  %v8597_v54 = vpop.permute.xlu1 %8596  ;;  %v5242_v55 = vadd.f32 %v5094_v53, %v4910_v51 }
 0x240   : > { %9496 = vmatmul.mubr.msk.f32.vlgmr.msra.gmra.mxu1 %vm356_vm1, %v9494_v48  ;;  %v8587_v56 = vpop.permute.xlu0 %8586  ;;  %v5163_v57 = vpop.f32.mrf.mxu0  ;;  %v8609_v10 = vsel %vm8604_vm9, %v8595_v41, %v8597_v54 }
 0x241   : > { %v8605_v58 = vsel %vm8604_vm9, %v8587_v56, %v8589_v38  ;;  %8901 = vmatprep.mubr.f32.mxu1 %v9604_v0  ;;  %v5243_v59 = vadd.f32 %v5163_v57, %v4911_v17 }
 0x242   : > { %8655 = vmatpush1.msra.mxu0 %v8605_v58  ;;  %v5165_v60 = vpop.f32.mrf.mxu0 }
 0x243   : > { %9495 = vmatmul.mubr.msk.f32.vlgmr.msra.gmra.mxu0 %vm356_vm1, %v9494_v48  ;;  %v8601_v2 = vpop.permute.xlu1 %8600  ;;  %v5244_v61 = vadd.f32 %v5165_v60, %v4912_v29 }
 0x244   : > { %v8599_v62 = vpop.permute.xlu0 %8598  ;;  %8830 = vmatprep.mubr.f32.mxu0 %v9604_v0  ;;  %v5234_v63 = vpop.f32.mrf.mxu1 }
 0x245   : > { %v8610_v1 = vsel %vm8604_vm9, %v8597_v54, %v8599_v62  ;;  %v5245_v4 = vadd.f32 %v5234_v63, %v4913_v35  ;;  %v8611_v8 = vsel %vm8604_vm9, %v8599_v62, %v8601_v2 }
 0x246   : > { %8796 = vmatprep.subr.mxu0 %v8610_v1  ;;  %v5236_v6 = vpop.f32.mrf.mxu1 }
 0x247   : > { %8797 = vmatpush1.msra.mxu0 %v8609_v10  ;;  %v8921_v3 = vpop.permute.xlu1 %8920  ;;  %v5246_v11 = vadd.f32 %v5236_v6, %v4914_v37 }
 0x248   : > { %9497 = vmatmul.mubr.msk.f32.vlgmr.msra.gmra.mxu0 %vm356_vm1, %v9494_v48  ;;  %v8603_v12 = vpop.permute.xlu0 %8602 }
 0x249   : > { %v8612_v13 = vsel %vm8604_vm9, %v8601_v2, %v8603_v12  ;;  %9020 = vmatprep.mubr.f32.mxu0 %v9604_v0 }
 0x24a   : > { %8867 = vmatprep.subr.mxu1 %v8612_v13 }
 0x24b   : > { %8868 = vmatpush1.msra.mxu1 %v8611_v8  ;;  %v8925_v5 = vpop.permute.xlu1 %8924 }
 0x24c   : > { %9498 = vmatmul.mubr.msk.f32.vlgmr.msra.gmra.mxu1 %vm356_vm1, %v9494_v48  ;;  %v8923_v23 = vpop.permute.xlu0 %8922  ;;  %v5423_v14 = vpop.f32.mrf.mxu1 }
 0x24d   : > { %v8938_v9 = vsel %vm8936_vm10, %v8921_v3, %v8923_v23  ;;  %9091 = vmatprep.mubr.f32.mxu1 %v9604_v0  ;;  %v10719_v51 = vadd.f32 %v5423_v14, %v5241_v49  ;;  %v8939_v34 = vsel %vm8936_vm10, %v8923_v23, %v8925_v5 }
 0x24e   : > { %8986 = vmatprep.subr.mxu0 %v8938_v9  ;;  %v5425_v15 = vpop.f32.mrf.mxu1 }
 0x24f   : > { %v8919_v7 = vpop.permute.xlu1 %8918  ;;  %v5352_v16 = vpop.f32.mrf.mxu0  ;;  %v10724_v20 = vadd.f32 %v5425_v15, %v5242_v55 }
 0x250   : > { %v8937_v18 = vsel %vm8936_vm10, %v8919_v7, %v8921_v3  ;;  %v8927_v19 = vpop.permute.xlu0 %8926  ;;  %v10727_v21 = vadd.f32 %v5352_v16, %v5239_v44 }
 0x251   : > { %8987 = vmatpush1.msra.mxu0 %v8937_v18  ;;  %v8940_v22 = vsel %vm8936_vm10, %v8925_v5, %v8927_v19  ;;  %v5354_v24 = vpop.f32.mrf.mxu0 }
 0x252   : > { %9057 = vmatprep.subr.mxu1 %v8940_v22  ;;  %9500 = vmatmul.mubr.msk.f32.vlgmr.msra.gmra.mxu0 %vm356_vm1, %v9499_v26  ;;  %v10732_v25 = vadd.f32 %v5354_v24, %v5240_v52 }
 0x253   : > { %9058 = vmatpush1.msra.mxu1 %v8939_v34  ;;  %v8931_v17 = vpop.permute.xlu1 %8930  ;;  %9162 = vmatprep.mubr.f32.mxu0 %v9604_v0 }
 0x254   : > { %9501 = vmatmul.mubr.msk.f32.vlgmr.msra.gmra.mxu1 %vm356_vm1, %v9499_v26  ;;  %v8929_v27 = vpop.permute.xlu0 %8928  ;;  %v5494_v28 = vpop.f32.mrf.mxu0 }
 0x255   : > { %v8941_v29 = vsel %vm8936_vm10, %v8927_v19, %v8929_v27  ;;  %v8942_v30 = vsel %vm8936_vm10, %v8929_v27, %v8931_v17  ;;  %9233 = vmatprep.mubr.f32.mxu1 %v9604_v0  ;;  %v10739_v32 = vadd.f32 %v5494_v28, %v5243_v59 }
 0x256   : > { %9128 = vmatprep.subr.mxu0 %v8942_v30  ;;  %v5496_v39 = vpop.f32.mrf.mxu0 }
 0x257   : > { %9129 = vmatpush1.msra.mxu0 %v8941_v29  ;;  %v8935_v33 = vpop.permute.xlu1 %8934  ;;  %v10741_v35 = vadd.f32 %v5496_v39, %v5244_v61 }
 0x258   : > { %9502 = vmatmul.mubr.msk.f32.vlgmr.msra.gmra.mxu0 %vm356_vm1, %v9499_v26  ;;  %v8933_v36 = vpop.permute.xlu0 %8932  ;;  %v5565_v31 = vpop.f32.mrf.mxu1 }
 0x259   : > { %v8943_v37 = vsel %vm8936_vm10, %v8931_v17, %v8933_v36  ;;  %v8944_v38 = vsel %vm8936_vm10, %v8933_v36, %v8935_v33  ;;  %v5576_v40 = vadd.f32 %v5565_v31, %v5245_v4 }
 0x25a   : > { %9199 = vmatprep.subr.mxu1 %v8944_v38  ;;  %v5567_v41 = vpop.f32.mrf.mxu1 }
 0x25b   : > { %9200 = vmatpush1.msra.mxu1 %v8943_v37  ;;  %v5577_v0 = vadd.f32 %v5567_v41, %v5246_v11 }
 0x25c   : > { %9503 = vmatmul.mubr.msk.f32.vlgmr.msra.gmra.mxu1 %vm356_vm1, %v9499_v26 }
 0x25f   : > { %v10755_v48 = vpop.f32.mrf.mxu0 }
 0x260   : > { %v10747_v42 = vpop.f32.mrf.mxu1 }
 0x261   : > { %v10757_v49 = vpop.f32.mrf.mxu0 }
 0x262   : > { %v10749_v43 = vpop.f32.mrf.mxu1 }
 0x264   : > { %v10759_v50 = vpop.f32.mrf.mxu0 }
 0x266   : > { %v10761_v52 = vpop.f32.mrf.mxu0 }
 0x268   : > { %v5897_v44 = vpop.f32.mrf.mxu1 }
 0x269   : > { %v10751_v45 = vadd.f32 %v5897_v44, %v5576_v40 }
 0x26a   : > { %v5899_v46 = vpop.f32.mrf.mxu1 }
 0x26b   : > { %v10753_v47 = vadd.f32 %v5899_v46, %v5577_v0 }
 0x270   : > { %v6087_v59 = vpop.f32.mrf.mxu1 }
 0x272   : > { %v10777_v2 = vpop.f32.mrf.mxu1 }
 0x273   : > { %v10763_v53 = vpop.f32.mrf.mxu0 }
 0x275   : > { %v10765_v54 = vpop.f32.mrf.mxu0 }
 0x278   : > { %v10767_v55 = vpop.f32.mrf.mxu0 }
 0x27a   : > { %v10769_v56 = vpop.f32.mrf.mxu0 }
 0x27c   : > { %v10779_v61 = vpop.f32.mrf.mxu1 }
 0x27e   : > { %v10785_v1 = vpop.f32.mrf.mxu1 }
 0x283   : > { %v10771_v57 = vpop.f32.mrf.mxu0 }
 0x284   : > { %v6437_v4 = vpop.f32.mrf.mxu1 }
 0x285   : > { %v10773_v58 = vpop.f32.mrf.mxu0 }
 0x286   : > { %v10789_v6 = vpop.f32.mrf.mxu1 }
 0x288   : > { %v10775_v60 = vpop.f32.mrf.mxu0 }
 0x28a   : > { %v10781_v62 = vpop.f32.mrf.mxu0 }
 0x28c   : > { %v10793_v11 = vpop.f32.mrf.mxu1 }
 0x28e   : > { %v10797_v13 = vpop.f32.mrf.mxu1 }
 0x294   : > { %v6769_v5 = vpop.f32.mrf.mxu1 }
 0x296   : > { %v10803_v14 = vpop.f32.mrf.mxu1 }
 0x297   : > { %v10783_v63 = vpop.f32.mrf.mxu0 }
 0x299   : > { %v10787_v10 = vpop.f32.mrf.mxu0 }
 0x29c   : > { %v10791_v3 = vpop.f32.mrf.mxu0 }
 0x29e   : > { %v10795_v12 = vpop.f32.mrf.mxu0 }
 0x2a0   : > { %v10805_v9 = vpop.f32.mrf.mxu1 }
 0x2a2   : > { %v10809_v7 = vpop.f32.mrf.mxu1 }
 0x2a3   : > { %10969 = vst [vmem:[#allocation3_spill] sm:$0xff] %v10809_v7 }
 0x2a7   : > { %v10799_v8 = vpop.f32.mrf.mxu0 }
 0x2a8   : > { %v7101_v16 = vpop.f32.mrf.mxu1 }
 0x2a9   : > { %v10801_v23 = vpop.f32.mrf.mxu0 }
 0x2aa   : > { %v10813_v19 = vpop.f32.mrf.mxu1 }
 0x2ac   : > { %v10807_v15 = vpop.f32.mrf.mxu0 }
 0x2ae   : > { %v10811_v26 = vpop.f32.mrf.mxu0 }
 0x2b0   : > { %v10817_v24 = vpop.f32.mrf.mxu1 }
 0x2b1   : > { %10970 = vst [vmem:[#allocation4_spill] sm:$0xff] %v10817_v24 }
 0x2b2   : > { %v10821_v17 = vpop.f32.mrf.mxu1 }
 0x2b3   : > { %10971 = vst [vmem:[#allocation5_spill] sm:$0xff] %v10821_v17 }
 0x2b8   : > { %v7433_v27 = vpop.f32.mrf.mxu1 }
 0x2ba   : > { %v10825_v30 = vpop.f32.mrf.mxu1 }
 0x2bb   : > { %v7362_v18 = vpop.f32.mrf.mxu0 }
 0x2bd   : > { %v10815_v22 = vpop.f32.mrf.mxu0 }
 0x2c0   : > { %v10819_v34 = vpop.f32.mrf.mxu0 }
 0x2c2   : > { %v10823_v28 = vpop.f32.mrf.mxu0 }
 0x2c3   : > { %10972 = vst [vmem:[#allocation6_spill] sm:$0xff] %v10823_v28 }
 0x2c4   : > { %v10827_v39 = vpop.f32.mrf.mxu1 }
 0x2c5   : > { %10973 = vst [vmem:[#allocation7_spill] sm:$0xff] %v10827_v39 }
 0x2c6   : > { %v10831_v36 = vpop.f32.mrf.mxu1 }
 0x2c7   : > { %10974 = vst [vmem:[#allocation8_spill] sm:$0xff] %v10831_v36 }
 0x2ca   : > { %v7694_v29 = vpop.f32.mrf.mxu0 }
 0x2cc   : > { %v10829_v33 = vpop.f32.mrf.mxu0  ;;  %v10835_v37 = vpop.f32.mrf.mxu1 }
 0x2ce   : > { %v10839_v40 = vpop.f32.mrf.mxu1 }
 0x2d0   : > { %v10833_v31 = vpop.f32.mrf.mxu0 }
 0x2d1   : > { %10975 = vst [vmem:[#allocation9_spill] sm:$0xff] %v10833_v31 }
 0x2d2   : > { %v10837_v38 = vpop.f32.mrf.mxu0 }
 0x2d3   : > { %10976 = vst [vmem:[#allocation10_spill] sm:$0xff] %v10837_v38 }
 0x2d4   : > { %v10841_v0 = vpop.f32.mrf.mxu1 }
 0x2d5   : > { %10977 = vst [vmem:[#allocation11_spill] sm:$0xff] %v10841_v0 }
 0x2d6   : > { %v10845_v46 = vpop.f32.mrf.mxu1 }
 0x2d7   : > { %10979 = vst [vmem:[#allocation13_spill] sm:$0xff] %v10845_v46  ;;  %v5902_v46 = vadd.f32 %v10755_v48, %v10727_v21 }
 0x2dc   : > { %v10847_v39 = vpop.f32.mrf.mxu1 }
 0x2dd   : > { %10980 = vst [vmem:[#allocation14_spill] sm:$0xff] %v10847_v39 }
 0x2de   : > { %v10851_v36 = vpop.f32.mrf.mxu1 }
 0x2df   : > { %v8026_v41 = vpop.f32.mrf.mxu0 }
 0x2e1   : > { %v10843_v44 = vpop.f32.mrf.mxu0 }
 0x2e2   : > { %10978 = vst [vmem:[#allocation12_spill] sm:$0xff] %v10843_v44 }
 0x2e4   : > { %v10849_v17 = vpop.f32.mrf.mxu0 }
 0x2e5   : > { %10981 = vst [vmem:[#allocation15_spill] sm:$0xff] %v10849_v17  ;;  %v5904_v17 = vadd.f32 %v10747_v42, %v10719_v51  ;;  %v5906_v51 = vadd.f32 %v10759_v50, %v10739_v32 }
 0x2e6   : > { %v10853_v31 = vpop.f32.mrf.mxu0 }
 0x2e7   : > { %10982 = vst [vmem:[#allocation16_spill] sm:$0xff] %v10853_v31  ;;  %v6234_v31 = vadd.f32 %v10763_v53, %v5902_v46 }
 0x2e8   : > { %v10855_v28 = vpop.f32.mrf.mxu1 }
 0x2e9   : > { %10983 = vst [vmem:[#allocation17_spill] sm:$0xff] %v10855_v28  ;;  %v5903_v28 = vadd.f32 %v10757_v49, %v10732_v25  ;;  %v6584_v48 = vadd.f32 %v10771_v57, %v6234_v31 }
 0x2ea   : > { %v10857_v24 = vpop.f32.mrf.mxu1 }
 0x2eb   : > { %10984 = vst [vmem:[#allocation18_spill] sm:$0xff] %v10857_v24  ;;  %v6235_v21 = vadd.f32 %v10765_v54, %v5903_v28  ;;  %v6916_v46 = vadd.f32 %v10783_v63, %v6584_v48 }
 0x2ed   : > { %v6585_v53 = vadd.f32 %v10773_v58, %v6235_v21  ;;  %v7248_v50 = vadd.f32 %v10799_v8, %v6916_v46 }
 0x2ee   : > { %v8358_v38 = vpop.f32.mrf.mxu0 }
 0x2ef   : > { %v6917_v32 = vadd.f32 %v10787_v10, %v6585_v53  ;;  %v10997_v53 = vld [vmem:[#allocation5_spill] sm:$0xff] }
 0x2f0   : > { %v10859_v7 = vpop.f32.mrf.mxu0  ;;  %v10861_v0 = vpop.f32.mrf.mxu1 }
 0x2f1   : > { %10985 = vst [vmem:[#allocation19_spill] sm:$0xff] %v10859_v7  ;;  %10986 = vst [vmem:[#allocation20_spill] sm:$0xff] %v10861_v0  ;;  %v6236_v0 = vadd.f32 %v6087_v59, %v5904_v17 }
 0x2f2   : > { %v10867_v39 = vpop.f32.mrf.mxu1 }
 0x2f3   : > { %v6586_v49 = vadd.f32 %v6437_v4, %v6236_v0 }
 0x2f4   : > { %v10863_v44 = vpop.f32.mrf.mxu0 }
 0x2f5   : > { %10987 = vst [vmem:[#allocation21_spill] sm:$0xff] %v10863_v44  ;;  %v5905_v44 = vadd.f32 %v10749_v43, %v10724_v20  ;;  %v6238_v20 = vadd.f32 %v10767_v55, %v5906_v51  ;;  %v6918_v57 = vadd.f32 %v6769_v5, %v6586_v49  ;;  %v7580_v55 = vadd.f32 %v7362_v18, %v7248_v50 }
 0x2f6   : > { %v10874_v24 = vpop.f32.mrf.mxu0 }
 0x2f7   : > { %v6237_v25 = vadd.f32 %v10777_v2, %v5905_v44  ;;  %v6588_v58 = vadd.f32 %v10775_v60, %v6238_v20 }
 0x2f8   : > { %v10876_v7 = vpop.f32.mrf.mxu1  ;;  %v10995_v48 = vld [vmem:[#allocation20_spill] sm:$0xff] }
 0x2f9   : > { %10988 = vst [vmem:[#allocation22_spill] sm:$0xff] %v10876_v7  ;;  %v5907_v7 = vadd.f32 %v10761_v52, %v10741_v35  ;;  %v6587_v54 = vadd.f32 %v10789_v6, %v6237_v25  ;;  %v7250_v35 = vadd.f32 %v7101_v16, %v6918_v57  ;;  %v7249_v52 = vadd.f32 %v10801_v23, %v6917_v32  ;;  %v11000_v32 = vld [vmem:[#allocation15_spill] sm:$0xff] }
 0x2fa   : > { %v10890_v43 = vpop.f32.mrf.mxu1  ;;  %v6240_v6 = vadd.f32 %v10779_v61, %v10751_v45  ;;  %v6920_v10 = vadd.f32 %v10791_v3, %v6588_v58 }
 0x2fb   : > { %v6239_v59 = vadd.f32 %v10769_v56, %v5907_v7  ;;  %v6919_v4 = vadd.f32 %v10803_v14, %v6587_v54  ;;  %v7582_v56 = vadd.f32 %v7433_v27, %v7250_v35  ;;  %v7581_v60 = vadd.f32 %v10815_v22, %v7249_v52  ;;  %v10989_v27 = vld [vmem:[#allocation14_spill] sm:$0xff]  ;;  %v11001_v52 = vld [vmem:[#allocation8_spill] sm:$0xff] }
 0x2fc   : > { %v7912_v7 = vadd.f32 %v7694_v29, %v7580_v55  ;;  %v6241_v14 = vadd.f32 %v10785_v1, %v10753_v47  ;;  %v6590_v16 = vadd.f32 %v10793_v11, %v6240_v6  ;;  %v7252_v18 = vadd.f32 %v10807_v15, %v6920_v10  ;;  %v10990_v29 = vld [vmem:[#allocation12_spill] sm:$0xff]  ;;  %v10999_v54 = vld [vmem:[#allocation10_spill] sm:$0xff]  ;;  %v11002_v6 = vld [vmem:[#allocation11_spill] sm:$0xff] }
 0x2fd   : > { %v6589_v5 = vadd.f32 %v10781_v62, %v6239_v59  ;;  %v7251_v8 = vadd.f32 %v10813_v19, %v6919_v4  ;;  %v7914_v3 = vadd.f32 %v10835_v37, %v7582_v56  ;;  %v7913_v19 = vadd.f32 %v10829_v33, %v7581_v60  ;;  %v10991_v37 = vld [vmem:[#allocation3_spill] sm:$0xff]  ;;  %v11003_v10 = vld [vmem:[#allocation16_spill] sm:$0xff] }
 0x2fe   : > { %v8244_v22 = vadd.f32 %v8026_v41, %v7912_v7  ;;  %v6591_v17 = vadd.f32 %v10797_v13, %v6241_v14  ;;  %v6922_v47 = vadd.f32 %v10805_v9, %v6590_v16  ;;  %v7584_v11 = vadd.f32 %v10819_v34, %v7252_v18  ;;  %v10992_v41 = vld [vmem:[#allocation4_spill] sm:$0xff]  ;;  %v10993_v13 = vld [vmem:[#allocation6_spill] sm:$0xff]  ;;  %v10994_v9 = vld [vmem:[#allocation9_spill] sm:$0xff] }
 0x2ff   : > { %v6921_v23 = vadd.f32 %v10795_v12, %v6589_v5  ;;  %v7583_v62 = vadd.f32 %v10825_v30, %v7251_v8  ;;  %v8246_v28 = vadd.f32 %v10989_v27, %v7914_v3  ;;  %v8245_v30 = vadd.f32 %v10990_v29, %v7913_v19  ;;  %v11004_v7 = vld [vmem:[#allocation21_spill] sm:$0xff] }
 0x300   : > { %v8761_v2 = vpop.f32.mrf.mxu1  ;;  %v8576_v31 = vadd.f32 %v8358_v38, %v8244_v22  ;;  %v6923_v33 = vadd.f32 %v10991_v37, %v6591_v17  ;;  %v7254_v0 = vadd.f32 %v10992_v41, %v6922_v47  ;;  %v7916_v21 = vadd.f32 %v10994_v9, %v7584_v11  ;;  %v10998_v38 = vld [vmem:[#allocation7_spill] sm:$0xff]  ;;  %v11008_v11 = vld [vmem:[#allocation22_spill] sm:$0xff] }
 0x301   : > { %v7253_v1 = vadd.f32 %v10811_v26, %v6921_v23  ;;  %v7915_v15 = vadd.f32 %v10839_v40, %v7583_v62  ;;  %v8578_v51 = vadd.f32 %v10995_v48, %v8246_v28  ;;  %v10996_v40 = vld [vmem:[#allocation19_spill] sm:$0xff]  ;;  %v11006_v62 = vld [vmem:[#allocation17_spill] sm:$0xff] }
 0x302   : > { %v8763_v45 = vpop.f32.mrf.mxu1  ;;  %v8577_v25 = vadd.f32 %v10996_v40, %v8245_v30  ;;  %v7255_v46 = vadd.f32 %v10997_v53, %v6923_v33  ;;  %v7586_v20 = vadd.f32 %v10998_v38, %v7254_v0  ;;  %v8248_v50 = vadd.f32 %v11000_v32, %v7916_v21 }
 0x303   : > { %v8690_v42 = vpop.f32.mrf.mxu0  ;;  %v7585_v44 = vadd.f32 %v10993_v13, %v7253_v1  ;;  %v8247_v34 = vadd.f32 %v10851_v36, %v7915_v15  ;;  %v8910_v4 = vadd.f32 %v8761_v2, %v8578_v51  ;;  %v11005_v2 = vld [vmem:[#allocation13_spill] sm:$0xff]  ;;  %v11007_v1 = vld [vmem:[#allocation18_spill] sm:$0xff] }
 0x304   : > { %v8908_v49 = vadd.f32 %v8690_v42, %v8576_v31  ;;  %v7587_v55 = vadd.f32 %v11001_v52, %v7255_v46  ;;  %v7918_v5 = vadd.f32 %v11002_v6, %v7586_v20  ;;  %v8580_v14 = vadd.f32 %v11004_v7, %v8248_v50 }
 0x305   : > { %v8692_v63 = vpop.f32.mrf.mxu0  ;;  %v7917_v57 = vadd.f32 %v10999_v54, %v7585_v44  ;;  %v8579_v58 = vadd.f32 %v10867_v39, %v8247_v34 }
 0x306   : > { %v8909_v42 = vadd.f32 %v8692_v63, %v8577_v25  ;;  %v7919_v63 = vadd.f32 %v11005_v2, %v7587_v55  ;;  %v8250_v3 = vadd.f32 %v11006_v62, %v7918_v5 }
 0x307   : > { %v8249_v8 = vadd.f32 %v11003_v10, %v7917_v57  ;;  %v8911_v16 = vadd.f32 %v8763_v45, %v8579_v58 }
 0x308   : > { %v8832_v61 = vpop.f32.mrf.mxu0  ;;  %v8251_v45 = vadd.f32 %v11007_v1, %v7919_v63  ;;  %v8582_v15 = vadd.f32 %v11008_v11, %v8250_v3 }
 0x309   : > { %v8581_v19 = vadd.f32 %v10874_v24, %v8249_v8  ;;  %v8912_v22 = vadd.f32 %v8832_v61, %v8580_v14 }
 0x30a   : > { %v8834_v26 = vpop.f32.mrf.mxu0  ;;  %v8583_v30 = vadd.f32 %v10890_v43, %v8251_v45 }
 0x30b   : > { %v8913_v27 = vadd.f32 %v8834_v26, %v8581_v19 }
 0x30c   : > { %v8903_v12 = vpop.f32.mrf.mxu1 }
 0x30d   : > { %v8914_v31 = vadd.f32 %v8903_v12, %v8582_v15 }
 0x30e   : > { %v8905_v59 = vpop.f32.mrf.mxu1 }
 0x30f   : > { %v8915_v37 = vadd.f32 %v8905_v59, %v8583_v30 }
 0x312   : > { %v9022_v36 = vpop.f32.mrf.mxu0 }
 0x313   : > { %v9240_v35 = vadd.f32 %v9022_v36, %v8908_v49 }
 0x314   : > { %v9093_v56 = vpop.f32.mrf.mxu1  ;;  %v9024_v60 = vpop.f32.mrf.mxu0 }
 0x315   : > { %9248 = vst [vmem:[%s10935_s18] sm:$0xff] %v9240_v35  ;;  %v9242_v23 = vadd.f32 %v9093_v56, %v8910_v4  ;;  %v9241_v39 = vadd.f32 %v9024_v60, %v8909_v42 }
 0x316   : > { %v9095_v18 = vpop.f32.mrf.mxu1 }
 0x317   : > { %9250 = vst [vmem:[%s10935_s18 + $0x10] sm:$0xff] %v9242_v23  ;;  %9249 = vst [vmem:[%s10935_s18 + $0x8] sm:$0xff] %v9241_v39  ;;  %v9243_v17 = vadd.f32 %v9095_v18, %v8911_v16 }
 0x318   : > { %v9164_v47 = vpop.f32.mrf.mxu0 }
 0x319   : > { %9251 = vst [vmem:[%s10935_s18 + $0x18] sm:$0xff] %v9243_v17  ;;  %v9244_v28 = vadd.f32 %v9164_v47, %v8912_v22 }
 0x31a   : > { %v9166_v29 = vpop.f32.mrf.mxu0 }
 0x31b   : > { %9252 = vst [vmem:[%s10935_s18 + $0x20] sm:$0xff] %v9244_v28  ;;  %v9245_v24 = vadd.f32 %v9166_v29, %v8913_v27 }
 0x31c   : > { %v9235_v61 = vpop.f32.mrf.mxu1 }
 0x31d   : > { %9253 = vst [vmem:[%s10935_s18 + $0x28] sm:$0xff] %v9245_v24  ;;  %v9246_v33 = vadd.f32 %v9235_v61, %v8914_v31 }
 0x31e   : > { %v9237_v41 = vpop.f32.mrf.mxu1 }
 0x31f   : > { %9254 = vst [vmem:[%s10935_s18 + $0x30] sm:$0xff] %v9246_v33  ;;  %v9247_v0 = vadd.f32 %v9237_v41, %v8915_v37 }
 0x321   : > { %9255 = vst [vmem:[%s10935_s18 + $0x38] sm:$0xff] %v9247_v0 }
 0x322 PF: > { %s13_s14 = sadd.s32 1, %s9602_s14   ;;  %s11009_s12 = smov %s9598_s13 }
 0x323   : > { %p10_p5 = scmp.ge.s32.totalorder %s13_s14, 4   ;;  %s11010_s13 = smov %s11012_s15 }
 0x325   :  { %12 = sbr.rel (!%p10_p5) target bundleno = 2 (0x2), region = 91 }

</bundles_post_ra>
